<compile_context>
chip_gen: v7x
topology: tpu7x:2x2x1
jax: 0.10.0
libtpu: 0.0.40
codegen_flags: <defaults>
</compile_context>

<pallas_src>
import functools

import numpy as np
import jax
import jax.numpy as jnp
from jax.experimental import pallas as pl
from jax.experimental.pallas import tpu as pltpu


def _round_up(x, m):
    return (x + m - 1) // m * m


def _tt_bag_kernel(idx_ref, c01e_hbm, c2e_hbm, out_ref,
                   c01e_vmem, c2e_vmem, acc_ref, copy_sem, *,
                   p01, p2, r2, d_pad, tile_n, b_pad, compute_dtype):
    """One tile of TN lookups: TT lookup + fused bag-sum.

    idx_ref   : (3, TN) int32 VMEM block, rows = [i01, i2, rowidx]
    c01e_hbm  : (P0*P1, R2*d_pad)  merged + lane-expanded cores 0,1 (HBM)
    c2e_hbm   : (P2,    R2*d_pad)  lane-expanded core 2             (HBM)
    out_ref   : (B_pad, d_pad) f32 bag sums (written on the last step)
    c01e_vmem / c2e_vmem : single-buffered VMEM copies of the tables
    acc_ref   : (B_pad, d_pad) f32 resident accumulator
    """
    step = pl.program_id(0)

    @pl.when(step == 0)
    def _():
        # One-time table load (single-buffered, no per-step table DMA) and
        # accumulator init.
        cp0 = pltpu.make_async_copy(c01e_hbm, c01e_vmem, copy_sem.at[0])
        cp1 = pltpu.make_async_copy(c2e_hbm, c2e_vmem, copy_sem.at[1])
        cp0.start()
        cp1.start()
        cp0.wait()
        cp1.wait()
        acc_ref[...] = jnp.zeros_like(acc_ref)

    idx = idx_ref[...]                       # (3, TN) int32
    i01 = idx[0:1, :]                        # (1, TN)
    i2 = idx[1:2, :]                         # (1, TN)
    row = idx[2:3, :]                        # (1, TN)

    # One-hot gathers on the MXU.  One-hots are (rows, TN) so the lane-dense
    # index rows broadcast along sublanes with no relayout; row selection is
    # exact even in bf16.
    oh01 = (jax.lax.broadcasted_iota(jnp.int32, (p01, tile_n), 0) == i01
            ).astype(compute_dtype)           # (P01, TN)
    oh2 = (jax.lax.broadcasted_iota(jnp.int32, (p2, tile_n), 0) == i2
           ).astype(compute_dtype)            # (P2, TN)

    g01 = jax.lax.dot_general(oh01, c01e_vmem[...], (((0,), (0,)), ((), ())),
                              preferred_element_type=jnp.float32)  # (TN, R2*D)
    g2 = jax.lax.dot_general(oh2, c2e_vmem[...], (((0,), (0,)), ((), ())),
                             preferred_element_type=jnp.float32)   # (TN, R2*D)

    # Remaining rank-R2 contraction: R2 full-width, 128-lane-aligned
    # multiply-adds (static slices).
    emb = g01[:, 0:d_pad] * g2[:, 0:d_pad]
    for s in range(1, r2):
        emb = emb + (g01[:, s * d_pad:(s + 1) * d_pad]
                     * g2[:, s * d_pad:(s + 1) * d_pad])

    # Fused bag-sum (EmbeddingBag mode='sum'): segment matmul on the MXU into
    # the resident accumulator.  Padded / invalid lookups carry rowidx ==
    # batch_size (the dummy row) and are sliced off by the wrapper.
    ohb = (jax.lax.broadcasted_iota(jnp.int32, (b_pad, tile_n), 0) == row
           ).astype(compute_dtype)            # (B_pad, TN)
    acc_ref[...] += jax.lax.dot_general(ohb, emb.astype(compute_dtype),
                                        (((1,), (0,)), ((), ())),
                                        preferred_element_type=jnp.float32)

    @pl.when(step == pl.num_programs(0) - 1)
    def _():
        out_ref[...] = acc_ref[...]


def _fold_tt_cores(tt_cores, tt_p_shapes, tt_q_shapes, tt_ranks,
                   embedding_dim, d_pad, table_dtype):
    """Merge cores 0+1 and expand both factors to lane-dense (rows, R2*d_pad)."""
    P0, P1, P2 = tt_p_shapes
    Q0, Q1, Q2 = tt_q_shapes
    _, R1, R2, _ = tt_ranks
    E = Q0 * Q1 * Q2
    assert embedding_dim <= E

    c0 = tt_cores[0].astype(jnp.float32).reshape(P0, Q0, R1)
    c1 = tt_cores[1].astype(jnp.float32).reshape(P1, R1, Q1, R2)
    c2 = tt_cores[2].astype(jnp.float32).reshape(P2, R2, Q2)

    # C01[i1*P0 + i0, a, b, s] = sum_r c0[i0, a, r] * c1[i1, r, b, s]
    c01 = jnp.einsum('iar,jrbs->jiabs', c0, c1).reshape(P0 * P1, Q0, Q1, R2)
    # TODO(synk): config-dependent shortcut — when P0*P1*P2*d_pad*itemsize is
    # tiny (<= a few MiB) fold all three cores and do a single one-hot gather
    # with K = P0*P1*P2 (deletes the second matmul and the R2 loop).

    # Lane-dense layout: output column d = a*Q1*Q2 + b*Q2 + c, one D slab per s.
    c01e = jnp.transpose(c01, (0, 3, 1, 2))                          # (P01,R2,Q0,Q1)
    c01e = jnp.broadcast_to(c01e[..., None], (P0 * P1, R2, Q0, Q1, Q2))
    c01e = c01e.reshape(P0 * P1, R2, E)[:, :, :embedding_dim]

    c2e = jnp.broadcast_to(c2[:, :, None, :], (P2, R2, Q0 * Q1, Q2))
    c2e = c2e.reshape(P2, R2, E)[:, :, :embedding_dim]

    pad = d_pad - embedding_dim
    if pad:
        c01e = jnp.pad(c01e, ((0, 0), (0, 0), (0, pad)))
        c2e = jnp.pad(c2e, ((0, 0), (0, 0), (0, pad)))
    return (c01e.reshape(P0 * P1, R2 * d_pad).astype(table_dtype),
            c2e.reshape(P2, R2 * d_pad).astype(table_dtype))


def tt_embedding_bag_forward(indices, offsets, tt_cores, *, embedding_dim,
                             tt_p_shapes, tt_q_shapes, tt_ranks,
                             tile_n=512, table_dtype=jnp.bfloat16):
    """Forward pass of TTEmbeddingBag with `offsets` (sum pooling)."""
    assert tile_n % 128 == 0, "tile_n must be a multiple of 128"
    P0, P1, P2 = tt_p_shapes
    _, R1, R2, _ = tt_ranks
    p01 = P0 * P1

    indices = indices.astype(jnp.int32)
    offsets = offsets.astype(jnp.int32)
    n = int(indices.shape[0])
    batch_size = int(offsets.shape[0]) - 1

    if n == 0:
        return jnp.zeros((batch_size, embedding_dim), jnp.float32)

    d_pad = _round_up(embedding_dim, 128)
    b_pad = _round_up(batch_size + 1, 8)     # +1 dummy row for padded/invalid lookups
    dummy_row = batch_size

    c01e, c2e = _fold_tt_cores(tt_cores, tt_p_shapes, tt_q_shapes, tt_ranks,
                               embedding_dim, d_pad, table_dtype)

    # rowidx[j] = bag of lookup j.  Lookups before offsets[0] (offsets[0] != 0)
    # map to the dummy row instead of silently wrapping into the last bag.
    rowidx = (jnp.searchsorted(offsets, jnp.arange(n, dtype=jnp.int32),
                               side='right') - 1).astype(jnp.int32)
    rowidx = jnp.where(rowidx < 0, dummy_row, rowidx)

    # Pad lookups to a multiple of tile_n; padded lookups use index 0 and the
    # dummy bag row (dropped after the kernel).
    n_pad = (-n) % tile_n
    if n_pad:
        indices = jnp.concatenate([indices, jnp.zeros((n_pad,), jnp.int32)])
        rowidx = jnp.concatenate(
            [rowidx, jnp.full((n_pad,), dummy_row, jnp.int32)])
    n_total = n + n_pad

    # Index split hoisted out of the kernel (div/mod by non-power-of-two P0*P1
    # is a multi-op VPU/scalar sequence if done per tile).
    i01 = (indices % p01).astype(jnp.int32)
    i2 = (indices // p01).astype(jnp.int32)
    packed = jnp.stack([i01, i2, rowidx], axis=0)     # (3, n_total), lane-dense

    kernel = functools.partial(
        _tt_bag_kernel, p01=p01, p2=P2, r2=R2, d_pad=d_pad, tile_n=tile_n,
        b_pad=b_pad, compute_dtype=table_dtype)

    # Explicit VMEM budget: single-buffered tables + resident accumulator/out
    # block + per-tile intermediates.  v5e's default scoped limit is 16 MiB;
    # cap at 64 MiB (v7x physical VMEM per TensorCore).
    itemsize = jnp.dtype(table_dtype).itemsize
    table_bytes = (c01e.size + c2e.size) * itemsize
    work_bytes = (3 * b_pad * d_pad * 4                 # out block + accumulator
                  + 2 * 3 * tile_n * 4                  # double-buffered idx blocks
                  + (p01 + P2 + b_pad) * tile_n * 4     # one-hots (f32 upper bound)
                  + 3 * tile_n * R2 * d_pad * 4)        # g01, g2, emb
    vmem_limit = int(min(max(table_bytes + work_bytes + (8 << 20), 32 << 20),
                         64 << 20))
    # TODO(synk): when P0*P1*R2*d_pad*itemsize exceeds the per-generation VMEM
    # budget (~24-28 MiB on v7x, much larger on v5e/v6e), switch to a DMA
    # row-gather path (scalar-prefetched i01, pl.ANY table, double-buffered
    # make_async_copy) instead of keeping the folded table resident.

    out = pl.pallas_call(
        kernel,
        out_shape=jax.ShapeDtypeStruct((b_pad, d_pad), jnp.float32),
        grid_spec=pltpu.PrefetchScalarGridSpec(
            num_scalar_prefetch=0,
            grid=(n_total // tile_n,),
            in_specs=[
                pl.BlockSpec((3, tile_n), lambda i: (0, i)),   # packed indices
                pl.BlockSpec(memory_space=pl.ANY),             # folded cores 0,1 (HBM)
                pl.BlockSpec(memory_space=pl.ANY),             # expanded core 2 (HBM)
            ],
            out_specs=pl.BlockSpec((b_pad, d_pad), lambda i: (0, 0)),
            scratch_shapes=[
                pltpu.VMEM(c01e.shape, table_dtype),           # resident table 0,1
                pltpu.VMEM(c2e.shape, table_dtype),            # resident table 2
                pltpu.VMEM((b_pad, d_pad), jnp.float32),       # bag-sum accumulator
                pltpu.SemaphoreType.DMA((2,)),                 # one-time table DMAs
            ]),
        compiler_params=pltpu.CompilerParams(
            dimension_semantics=("arbitrary",),
            vmem_limit_bytes=vmem_limit),
    )(packed, c01e, c2e)

    # TODO(synk): for very large batch sizes tile the batch dimension too
    # (rowidx is sorted, so each batch tile owns a contiguous lookup range that
    # can be scalar-prefetched), which also restores a "parallel" grid axis for
    # the second v7x TensorCore.
    return out[:batch_size, :embedding_dim]


def tt_embedding_bag_reference(indices, offsets, tt_cores, *, embedding_dim,
                               tt_p_shapes, tt_q_shapes, tt_ranks):
    """Plain-JAX f32 reference for the same semantics."""
    P0, P1, _ = tt_p_shapes
    Q0, Q1, Q2 = tt_q_shapes
    _, R1, R2, _ = tt_ranks
    n = indices.shape[0]
    B = offsets.shape[0] - 1
    rowidx = jnp.searchsorted(offsets, jnp.arange(n), side='right') - 1
    i0 = indices % P0
    i1 = (indices // P0) % P1
    i2 = indices // (P0 * P1)
    g0 = tt_cores[0][i0].reshape(n, Q0, R1)
    g1 = tt_cores[1][i1].reshape(n, R1, Q1, R2)
    g2 = tt_cores[2][i2].reshape(n, R2, Q2)
    t1 = jnp.einsum('nar,nrbs->nabs', g0, g1)
    emb = jnp.einsum('nabs,nsc->nabc', t1, g2).reshape(n, Q0 * Q1 * Q2)
    emb = emb[:, :embedding_dim]
    return jnp.zeros((B, embedding_dim), jnp.float32).at[rowidx].add(emb)


if __name__ == "__main__":
    key = jax.random.PRNGKey(0)

    # --- TTEmbeddingBag config (small, consistent with __init__ constraints) ---
    num_embeddings = 500
    embedding_dim = 128
    tt_p_shapes = [8, 8, 8]          # prod = 512 >= num_embeddings
    tt_q_shapes = [2, 4, 16]         # prod = 128 == embedding_dim
    tt_ranks = [1, 2, 2, 1]          # [1] + tt_ranks + [1]
    num_tt_core = 3

    # deterministic 'normal' init (reset_parameters): N(0, 1/sqrt(E)) * 1/r0
    sigma = 1.0 / np.sqrt(num_embeddings)
    scale = 1.0 / tt_ranks[0]
    keys = jax.random.split(key, num_tt_core + 1)
    tt_cores = []
    for i in range(num_tt_core):
        shape = (tt_p_shapes[i],
                 tt_ranks[i] * tt_q_shapes[i] * tt_ranks[i + 1])
        tt_cores.append(
            (scale * sigma) * jax.random.normal(keys[i], shape, jnp.float32))

    # --- small example batch: 128 bags of 8 lookups each (2 lookup tiles) ---
    batch_size = 128
    bag_len = 8
    n = batch_size * bag_len
    indices = jax.random.randint(keys[num_tt_core], (n,), 0, num_embeddings,
                                 dtype=jnp.int32)
    offsets = jnp.arange(0, n + 1, bag_len, dtype=jnp.int32)

    ref = tt_embedding_bag_reference(
        indices, offsets, tt_cores, embedding_dim=embedding_dim,
        tt_p_shapes=tt_p_shapes, tt_q_shapes=tt_q_shapes, tt_ranks=tt_ranks)

    # Exact (f32 tables) path.
    out_f32 = tt_embedding_bag_forward(
        indices, offsets, tt_cores, embedding_dim=embedding_dim,
        tt_p_shapes=tt_p_shapes, tt_q_shapes=tt_q_shapes, tt_ranks=tt_ranks,
        tile_n=512, table_dtype=jnp.float32)
    out_f32 = jax.block_until_ready(out_f32)
    assert out_f32.shape == (batch_size, embedding_dim)
    assert np.allclose(np.asarray(out_f32), np.asarray(ref),
                       rtol=1e-3, atol=1e-5)

    # bf16-table / bf16-MXU path (default): exact one-hot selection, tables and
    # per-lookup embeddings rounded to bf16, f32 accumulation.
    out_bf16 = tt_embedding_bag_forward(
        indices, offsets, tt_cores, embedding_dim=embedding_dim,
        tt_p_shapes=tt_p_shapes, tt_q_shapes=tt_q_shapes, tt_ranks=tt_ranks,
        tile_n=512, table_dtype=jnp.bfloat16)
    out_bf16 = jax.block_until_ready(out_bf16)
    assert out_bf16.shape == (batch_size, embedding_dim)
    assert np.allclose(np.asarray(out_bf16), np.asarray(ref),
                       rtol=5e-2, atol=1e-3)

    print("KERNEL_OK")
</pallas_src>

<mosaic_0001>
module attributes {stable_mosaic.version = 11 : i64} {
  func.func @_tt_bag_kernel(%arg0: i32, %arg1: memref<3x512xi32, #tpu.memory_space<vmem>>, %arg2: memref<64x256xf32, #tpu.memory_space<any>>, %arg3: memref<8x256xf32, #tpu.memory_space<any>>, %arg4: memref<136x128xf32, #tpu.memory_space<vmem>>, %arg5: memref<64x256xf32, #tpu.memory_space<vmem>>, %arg6: memref<8x256xf32, #tpu.memory_space<vmem>>, %arg7: memref<136x128xf32, #tpu.memory_space<vmem>>, %arg8: memref<2x!tpu.dma_semaphore, #tpu.memory_space<semaphore_mem>>) attributes {dimension_semantics = [#tpu.dimension_semantics<arbitrary>], iteration_bounds = array<i64: 2>, scalar_prefetch = 0 : i64, scratch_operands = 4 : i64, tpu.core_type = #tpu.core_type<tc>, window_params = [{transform_indices = @transform_0, window_bounds = array<i64: 3, 512>}, {}, {}, {pipeline_mode = #tpu.pipeline_mode<synchronous>, transform_indices = @transform_3, window_bounds = array<i64: 136, 128>}]} {
    %c0_i32 = arith.constant 0 : i32
    %0 = arith.cmpi eq, %arg0, %c0_i32 : i32
    %1 = arith.extui %0 : i1 to i32
    %c0_i32_0 = arith.constant 0 : i32
    %2 = arith.cmpi ne, %1, %c0_i32_0 : i32
    scf.if %2 {
      %c0_i32_13 = arith.constant 0 : i32
      %40 = tpu.memref_slice %arg8[%c0_i32_13] : memref<2x!tpu.dma_semaphore, #tpu.memory_space<semaphore_mem>> -> memref<1x!tpu.dma_semaphore, #tpu.memory_space<semaphore_mem>>
      %41 = tpu.memref_squeeze %40 : memref<1x!tpu.dma_semaphore, #tpu.memory_space<semaphore_mem>> -> memref<!tpu.dma_semaphore, #tpu.memory_space<semaphore_mem>>
      tpu.enqueue_dma source(%arg2 : memref<64x256xf32, #tpu.memory_space<any>>) target(%arg5 : memref<64x256xf32, #tpu.memory_space<vmem>>) target_semaphore(%41 : memref<!tpu.dma_semaphore, #tpu.memory_space<semaphore_mem>>)
      %c1_i32_14 = arith.constant 1 : i32
      %42 = tpu.memref_slice %arg8[%c1_i32_14] : memref<2x!tpu.dma_semaphore, #tpu.memory_space<semaphore_mem>> -> memref<1x!tpu.dma_semaphore, #tpu.memory_space<semaphore_mem>>
      %43 = tpu.memref_squeeze %42 : memref<1x!tpu.dma_semaphore, #tpu.memory_space<semaphore_mem>> -> memref<!tpu.dma_semaphore, #tpu.memory_space<semaphore_mem>>
      tpu.enqueue_dma source(%arg3 : memref<8x256xf32, #tpu.memory_space<any>>) target(%arg6 : memref<8x256xf32, #tpu.memory_space<vmem>>) target_semaphore(%43 : memref<!tpu.dma_semaphore, #tpu.memory_space<semaphore_mem>>)
      %c0_i32_15 = arith.constant 0 : i32
      %44 = tpu.memref_slice %arg8[%c0_i32_15] : memref<2x!tpu.dma_semaphore, #tpu.memory_space<semaphore_mem>> -> memref<1x!tpu.dma_semaphore, #tpu.memory_space<semaphore_mem>>
      %45 = tpu.memref_squeeze %44 : memref<1x!tpu.dma_semaphore, #tpu.memory_space<semaphore_mem>> -> memref<!tpu.dma_semaphore, #tpu.memory_space<semaphore_mem>>
      tpu.wait_dma2 semaphore(%45 : memref<!tpu.dma_semaphore, #tpu.memory_space<semaphore_mem>>) src(%arg2 : memref<64x256xf32, #tpu.memory_space<any>>) dst(%arg5 : memref<64x256xf32, #tpu.memory_space<vmem>>)
      %c1_i32_16 = arith.constant 1 : i32
      %46 = tpu.memref_slice %arg8[%c1_i32_16] : memref<2x!tpu.dma_semaphore, #tpu.memory_space<semaphore_mem>> -> memref<1x!tpu.dma_semaphore, #tpu.memory_space<semaphore_mem>>
      %47 = tpu.memref_squeeze %46 : memref<1x!tpu.dma_semaphore, #tpu.memory_space<semaphore_mem>> -> memref<!tpu.dma_semaphore, #tpu.memory_space<semaphore_mem>>
      tpu.wait_dma2 semaphore(%47 : memref<!tpu.dma_semaphore, #tpu.memory_space<semaphore_mem>>) src(%arg3 : memref<8x256xf32, #tpu.memory_space<any>>) dst(%arg6 : memref<8x256xf32, #tpu.memory_space<vmem>>)
      %cst_17 = arith.constant 0.000000e+00 : f32
      %48 = vector.broadcast %cst_17 : f32 to vector<136x128xf32>
      %c0_18 = arith.constant 0 : index
      %c0_19 = arith.constant 0 : index
      %49 = vector.load %arg7[%c0_18, %c0_19] : memref<136x128xf32, #tpu.memory_space<vmem>>, vector<136x128xf32>
      tpu.vector_store %arg7[%c0_18, %c0_19], %48 {strides = array<i32>} : memref<136x128xf32, #tpu.memory_space<vmem>>, vector<136x128xf32>,
    } else {
    }
    %c0 = arith.constant 0 : index
    %c0_1 = arith.constant 0 : index
    %3 = vector.load %arg1[%c0, %c0_1] : memref<3x512xi32, #tpu.memory_space<vmem>>, vector<3x512xi32>
    %4 = vector.extract_strided_slice %3 {offsets = [0, 0], sizes = [1, 512], strides = [1, 1]} : vector<3x512xi32> to vector<1x512xi32>
    %5 = vector.extract_strided_slice %3 {offsets = [1, 0], sizes = [1, 512], strides = [1, 1]} : vector<3x512xi32> to vector<1x512xi32>
    %6 = vector.extract_strided_slice %3 {offsets = [2, 0], sizes = [1, 512], strides = [1, 1]} : vector<3x512xi32> to vector<1x512xi32>
    %7 = tpu.iota {dimensions = array<i32: 0>} : vector<64x512xi32>
    %8 = vector.broadcast %4 : vector<1x512xi32> to vector<64x512xi32>
    %9 = arith.cmpi eq, %7, %8 : vector<64x512xi32>
    %10 = arith.extui %9 : vector<64x512xi1> to vector<64x512xi32>
    %11 = arith.sitofp %10 : vector<64x512xi32> to vector<64x512xf32>
    %12 = tpu.iota {dimensions = array<i32: 0>} : vector<8x512xi32>
    %13 = vector.broadcast %5 : vector<1x512xi32> to vector<8x512xi32>
    %14 = arith.cmpi eq, %12, %13 : vector<8x512xi32>
    %15 = arith.extui %14 : vector<8x512xi1> to vector<8x512xi32>
    %16 = arith.sitofp %15 : vector<8x512xi32> to vector<8x512xf32>
    %c0_2 = arith.constant 0 : index
    %c0_3 = arith.constant 0 : index
    %17 = vector.load %arg5[%c0_2, %c0_3] : memref<64x256xf32, #tpu.memory_space<vmem>>, vector<64x256xf32>
    %cst = arith.constant dense<0.000000e+00> : vector<512x256xf32>
    %18 = tpu.matmul %11, %17, %cst {dimension_numbers = #tpu.dot_dimension_numbers<[0], [0], [1], [1], [0, 1, 1, 1], [], []>} : vector<64x512xf32>, vector<64x256xf32>, vector<512x256xf32> -> vector<512x256xf32>
    %c0_4 = arith.constant 0 : index
    %c0_5 = arith.constant 0 : index
    %19 = vector.load %arg6[%c0_4, %c0_5] : memref<8x256xf32, #tpu.memory_space<vmem>>, vector<8x256xf32>
    %cst_6 = arith.constant dense<0.000000e+00> : vector<512x256xf32>
    %20 = tpu.matmul %16, %19, %cst_6 {dimension_numbers = #tpu.dot_dimension_numbers<[0], [0], [1], [1], [0, 1, 1, 1], [], []>} : vector<8x512xf32>, vector<8x256xf32>, vector<512x256xf32> -> vector<512x256xf32>
    %21 = vector.extract_strided_slice %18 {offsets = [0, 0], sizes = [512, 128], strides = [1, 1]} : vector<512x256xf32> to vector<512x128xf32>
    %22 = vector.extract_strided_slice %20 {offsets = [0, 0], sizes = [512, 128], strides = [1, 1]} : vector<512x256xf32> to vector<512x128xf32>
    %23 = arith.mulf %21, %22 : vector<512x128xf32>
    %24 = vector.extract_strided_slice %18 {offsets = [0, 128], sizes = [512, 128], strides = [1, 1]} : vector<512x256xf32> to vector<512x128xf32>
    %25 = vector.extract_strided_slice %20 {offsets = [0, 128], sizes = [512, 128], strides = [1, 1]} : vector<512x256xf32> to vector<512x128xf32>
    %26 = arith.mulf %24, %25 : vector<512x128xf32>
    %27 = arith.addf %23, %26 : vector<512x128xf32>
    %28 = tpu.iota {dimensions = array<i32: 0>} : vector<136x512xi32>
    %29 = vector.broadcast %6 : vector<1x512xi32> to vector<136x512xi32>
    %30 = arith.cmpi eq, %28, %29 : vector<136x512xi32>
    %31 = arith.extui %30 : vector<136x512xi1> to vector<136x512xi32>
    %32 = arith.sitofp %31 : vector<136x512xi32> to vector<136x512xf32>
    %c0_7 = arith.constant 0 : index
    %c0_8 = arith.constant 0 : index
    %33 = vector.load %arg7[%c0_7, %c0_8] : memref<136x128xf32, #tpu.memory_space<vmem>>, vector<136x128xf32>
    %cst_9 = arith.constant dense<0.000000e+00> : vector<136x128xf32>
    %34 = tpu.matmul %32, %27, %cst_9 {dimension_numbers = #tpu.dot_dimension_numbers<[1], [0], [0], [1], [0, 0, 1, 1], [], []>} : vector<136x512xf32>, vector<512x128xf32>, vector<136x128xf32> -> vector<136x128xf32>
    %35 = arith.addf %33, %34 : vector<136x128xf32>
    %c0_10 = arith.constant 0 : index
    %c0_11 = arith.constant 0 : index
    %36 = vector.load %arg7[%c0_10, %c0_11] : memref<136x128xf32, #tpu.memory_space<vmem>>, vector<136x128xf32>
    tpu.vector_store %arg7[%c0_10, %c0_11], %35 {strides = array<i32>} : memref<136x128xf32, #tpu.memory_space<vmem>>, vector<136x128xf32>,
    %c1_i32 = arith.constant 1 : i32
    %37 = arith.cmpi eq, %arg0, %c1_i32 : i32
    %38 = arith.extui %37 : i1 to i32
    %c0_i32_12 = arith.constant 0 : i32
    %39 = arith.cmpi ne, %38, %c0_i32_12 : i32
    scf.if %39 {
      %c0_13 = arith.constant 0 : index
      %c0_14 = arith.constant 0 : index
      %40 = vector.load %arg7[%c0_13, %c0_14] : memref<136x128xf32, #tpu.memory_space<vmem>>, vector<136x128xf32>
      %c0_15 = arith.constant 0 : index
      %c0_16 = arith.constant 0 : index
      %41 = vector.load %arg4[%c0_15, %c0_16] : memref<136x128xf32, #tpu.memory_space<vmem>>, vector<136x128xf32>
      tpu.vector_store %arg4[%c0_15, %c0_16], %40 {strides = array<i32>} : memref<136x128xf32, #tpu.memory_space<vmem>>, vector<136x128xf32>,
    } else {
    }
    return
  }
  func.func @transform_0(%arg0: i32) -> (i32, i32) {
    %c0_i32 = arith.constant 0 : i32
    %c0_i32_0 = arith.constant 0 : i32
    return %c0_i32, %arg0 : i32, i32
  }
  func.func @transform_3(%arg0: i32) -> (i32, i32) {
    %c0_i32 = arith.constant 0 : i32
    %c0_i32_0 = arith.constant 0 : i32
    %c0_i32_1 = arith.constant 0 : i32
    return %c0_i32, %c0_i32_0 : i32, i32
  }
}

</mosaic_0001>

<bundles_post_ra>
// kernel: tpu_custom_call.1
= control target key start
LH: loop header
LB: loop body
LE: loop exit
PB: predicated region body
PF: predicated region fallthrough
CT: control target
= control target key end

     0   :  { %8 = vsyncpa [#allocation7], 0  ;;  %s4443_s0 = inlined_call_operand.hbm [shape: s32[3,1024], index: 0, kind: input, shape index: {}]   ;;  %s4444_s1 = inlined_call_operand.hbm [shape: f32[64,256], index: 1, kind: input, shape index: {}]   ;;  %s4445_s2 = inlined_call_operand.hbm [shape: f32[8,256], index: 2, kind: input, shape index: {}]   ;;  %s4446_s3 = inlined_call_operand.hbm [shape: f32[136,128], index: 3, kind: output, shape index: {}]  }
   0x1   :  { %10 = vsyncpa [#allocation7 + $0x1], 0 }
   0x2   :  { %11 = vsyncpa [#allocation8], 0  ;;  %s3505_s12 = smov 0   ;;  %s3507_s13 = smov 0  }
   0x3   :  { %s3509_s14 = smov 0   ;;  %s3511_s15 = smov 0  }
   0x4 LB: > { %s3524_s16 = sadd.s32 4294967295, %s3473_s15   ;;  %s3527_s17 = sadd.s32 1, %s3473_s15   ;;  %s3473_s15 = sphi %s3511_s15, %s4460_s15   ;;  %s3469_s14 = sphi %s3509_s14, %s4459_s14   ;;  %s3465_s13 = sphi %s3507_s13, %s4458_s13   ;;  %s3461_s12 = sphi %s3505_s12, %s4457_s12  }
   0x5   : > { %s21_s18 = ssub.s32 %s3473_s15, %s3527_s17  ;;  %s24_s19 = sadd.s32 1, %s3469_s14 }
   0x6   : > { %p22_p0 = scmp.eq.s32.totalorder %s21_s18, 0  ;;  %p31_p1 = scmp.ne.s32.totalorder %s3469_s14, %s3465_s13 }
   0x7   : > { %p32_p2 = scmp.eq.s32.totalorder %s3473_s15, 0  ;;  %p37_p3 = scmp.ne.s32.totalorder %s3465_s13, %s3461_s12 }
   0x8   : > { %s3537_s20 = scalar_select %p22_p0, %s3469_s14, %s24_s19  }
   0x9   : > { %p33_p4 = por %p32_p2, %p31_p1  ;;  %p38_p5 = scmp.eq.s32.totalorder %s3524_s16, 0 }
   0xa   : > { %p3286_p6 = scmp.lt.s32.totalorder %s3473_s15, 2  ;;  %s82_s22 = sand.u32 1, %s3469_s14  }
   0xb   : > { %p3541_p7 = por %p38_p5, %p37_p3  ;;  %s2818_s23 = sshll.u32 %s82_s22, 4 }
   0xc   : > { %s3131_s24 = sshll.u32 %s3473_s15, 8  ;;  %s86_s28 = scalar_lea.vmem [#allocation6], %s2818_s23 }
   0xd   : > { %s3550_s27 = scalar_lea.hbm %s4443_s0, %s3131_s24  ;;  %s94_s29 = sshll.u32 %s86_s28, 4  ;;  %s3552_s29 = int_to_ptr.vmem [resolvable:$true] %s94_s29 }
   0xe   : > { %p3554_p8 = pnand %p3286_p6, %p33_p4  ;;  %s83_s4 = scalar_lea.sflag [#allocation7], %s82_s22 }
   0xf   : > { %s3331_s5 = scalar_lea.hbm %s3550_s27, 256  ;;  %s3336_s8 = scalar_lea.hbm %s4443_s0, 512 }
  0x10   : > { %p3332_p11 = scmp.ne.s32.totalorder %s3550_s27, %s3331_s5  ;;  %p3333_p12 = pneg %p3554_p8 }
  0x11   : > { %p3337_p1 = scmp.lt.u32.totalorder %s3550_s27, %s4443_s0  ;;  %p3338_p2 = scmp.lt.u32.totalorder %s3336_s8, %s3331_s5 }
  0x12   : > { %p3334_p13 = pnand %p3333_p12, %p3332_p11  ;;  %p3340_p4 = scmp.lt.u32.totalorder %s3331_s5, %s3550_s27 }
  0x13   : > { %p3339_p3 = por %p3338_p2, %p3337_p1 }
  0x14   : > { %p3335_p0 = pneg %p3334_p13 }
  0x15   : > { %p3341_p5 = por %p3340_p4, %p3339_p3 }
  0x17   : > { %p3342_p6 = pnand %p3341_p5, %p3335_p0 }
  0x19   : > { %3345 = shalt.err (!%p3342_p6)
}
  0x1a   : > { %s3346_s11 = scalar_lea.vmem %s3552_s29, 256  ;;  %s3475_s12 = smov [#allocation6]  }
  0x1b   : > { %p3347_p11 = scmp.ne.s32.totalorder %s3552_s29, %s3346_s11  ;;  %s3351_s18 = sshll.u32 %s3475_s12, 4  ;;  %s3352_s18 = int_to_ptr.vmem [resolvable:$false] %s3351_s18 }
  0x1c   : > { %s3353_s19 = scalar_lea.vmem %s3352_s18, 512  ;;  %p3354_p10 = scmp.lt.s32.totalorder %s3552_s29, %s3352_s18 }
  0x1d   : > { %p3349_p13 = pnand %p3347_p11, %p3333_p12  ;;  %p3355_p1 = scmp.lt.s32.totalorder %s3353_s19, %s3346_s11 }
  0x1f   : > { %p3350_p9 = pneg %p3349_p13  ;;  %p3356_p2 = por %p3355_p1, %p3354_p10 }
  0x21   : > { %p3357_p3 = pnand %p3356_p2, %p3350_p9 }
  0x23   : > { %3360 = shalt.err (!%p3357_p3)
}
  0x24   : > { %3285 = dma.hbm_to_vmem [thread:$0]  (!%p3554_p8), %s3550_s27, 256, %s3552_s29, %s83_s4  }
  0x25   : > { %p4449_p0 = scmp.lt.s32.totalorder %s3473_s15, 3  ;;  %p4450_p4 = scmp.ge.s32.totalorder %s3473_s15, 1 }
  0x27   : > { %p100_p12 = pnand %p4450_p4, %p4449_p0 }
  0x28   : > { %s105_s22 = sand.u32 (!%p100_p12), 1, %s3465_s13  }
  0x29   : > { %103 = sbr.rel (%p100_p12) target bundleno = 1024 (0x400), region = 24  ;;  %s2822_s23 = sshll.u32 (!%p100_p12), %s105_s22, 4 }
  0x2a   : > { %s106_s24 = scalar_lea.sflag (!%p100_p12), [#allocation7], %s105_s22  ;;  %s3590_s25 = scalar_lea.vmem (!%p100_p12), [#allocation6], %s2822_s23 }
  0x30   : > { %3448 = dma.done.wait (%p3541_p7), %s106_s24, 256  }
  0x31   : > { %3450 = vsyncadd (%p3541_p7), %s106_s24, 4294967040  ;;  %p2823_p9 = scmp.ne.s32.totalorder %s3524_s16, 0 }
  0x32   : > { %s3476_s26 = smov (!%p2823_p9), [#allocation2]   ;;  %s3477_s15 = smov (!%p2823_p9), [#allocation3]  }
  0x33   : > { %127 = sbr.rel (%p2823_p9) target bundleno = 96 (0x60), region = 32  ;;  %s135_s27 = sshll.u32 (!%p2823_p9), %s3476_s26, 4  ;;  %s136_s27 = int_to_ptr.vmem [resolvable:$true] %s135_s27 }
  0x34   : > { %s147_s28 = sshll.u32 (!%p2823_p9), %s3477_s15, 4  ;;  %s3361_s4 = scalar_lea.hbm (!%p2823_p9), %s4444_s1, 2048  ;;  %s148_s28 = int_to_ptr.vmem [resolvable:$true] %s147_s28 }
  0x35   : > { %p3362_p8 = scmp.ne.s32.totalorder (!%p2823_p9), %s4444_s1, %s3361_s4  ;;  %p3365_p7 = scmp.lt.u32.totalorder (!%p2823_p9), %s3361_s4, %s4444_s1 }
  0x37   : > { %p3367_p10 = pnand (!%p2823_p9), %p3365_p7, %p3362_p8 }
  0x3a   : > { %3370 = shalt.err (!%p3367_p10)  }
  0x3b   : > { %s3371_s8 = scalar_lea.vmem %s136_s27, 2048  ;;  %p3376_p6 = scmp.lt.s32.totalorder %s136_s27, %s136_s27 }
  0x3c   : > { %p3372_p5 = scmp.ne.s32.totalorder %s136_s27, %s3371_s8  ;;  %p3377_p11 = scmp.lt.s32.totalorder %s3371_s8, %s3371_s8 }
  0x3e   : > { %p3378_p13 = por %p3377_p11, %p3376_p6 }
  0x40   : > { %p3379_p1 = pnand %p3378_p13, %p3372_p5 }
  0x42   : > { %3382 = shalt.err (!%p3379_p1)  }
  0x43   : > { %138 = dma.hbm_to_vmem [thread:$0]  %s4444_s1, 2048, %s136_s27, [#allocation5] }
  0x44   : > { %s3383_s18 = scalar_lea.hbm %s4445_s2, 256 }
  0x45   : > { %p3384_p2 = scmp.ne.s32.totalorder %s4445_s2, %s3383_s18  ;;  %p3387_p3 = scmp.lt.u32.totalorder %s3383_s18, %s4445_s2 }
  0x47   : > { %p3389_p0 = pnand %p3387_p3, %p3384_p2 }
  0x49   : > { %3392 = shalt.err (!%p3389_p0)  }
  0x4a   : > { %s3393_s26 = scalar_lea.vmem %s148_s28, 256  ;;  %p3398_p12 = scmp.lt.s32.totalorder %s148_s28, %s148_s28 }
  0x4b   : > { %p3394_p4 = scmp.ne.s32.totalorder %s148_s28, %s3393_s26  ;;  %p3399_p9 = scmp.lt.s32.totalorder %s3393_s26, %s3393_s26 }
  0x4d   : > { %p3400_p8 = por %p3399_p9, %p3398_p12 }
  0x4f   : > { %p3401_p7 = pnand %p3400_p8, %p3394_p4 }
  0x51   : > { %3404 = shalt.err (!%p3401_p7)  }
  0x52   : > { %150 = dma.hbm_to_vmem [thread:$0]  %s4445_s2, 256, %s148_s28, [#allocation5 + $0x1] }
  0x53   : > { %3451 = dma.done.wait [#allocation5], 2048 }
  0x54   : > { %3452 = vsyncadd [#allocation5], 4294965248 }
  0x55   : > { %3453 = dma.done.wait [#allocation5 + $0x1], 256 }
  0x56   : > { %3454 = vsyncadd [#allocation5 + $0x1], 4294967040  ;;  %v3478_v0 = vmov 0.0  }
  0x57   : > { %159 = vst [vmem:[#allocation4] sm:$0xff] %v3478_v0  ;;  %160 = vst [vmem:[#allocation4 + $0x8] sm:$0xff] %v3478_v0 }
  0x58   : > { %161 = vst [vmem:[#allocation4 + $0x10] sm:$0xff] %v3478_v0  ;;  %162 = vst [vmem:[#allocation4 + $0x18] sm:$0xff] %v3478_v0 }
  0x59   : > { %163 = vst [vmem:[#allocation4 + $0x20] sm:$0xff] %v3478_v0  ;;  %164 = vst [vmem:[#allocation4 + $0x28] sm:$0xff] %v3478_v0 }
  0x5a   : > { %165 = vst [vmem:[#allocation4 + $0x30] sm:$0xff] %v3478_v0  ;;  %166 = vst [vmem:[#allocation4 + $0x38] sm:$0xff] %v3478_v0 }
  0x5b   : > { %167 = vst [vmem:[#allocation4 + $0x40] sm:$0xff] %v3478_v0  ;;  %168 = vst [vmem:[#allocation4 + $0x48] sm:$0xff] %v3478_v0 }
  0x5c   : > { %169 = vst [vmem:[#allocation4 + $0x50] sm:$0xff] %v3478_v0  ;;  %170 = vst [vmem:[#allocation4 + $0x58] sm:$0xff] %v3478_v0 }
  0x5d   : > { %171 = vst [vmem:[#allocation4 + $0x60] sm:$0xff] %v3478_v0  ;;  %172 = vst [vmem:[#allocation4 + $0x68] sm:$0xff] %v3478_v0 }
  0x5e   : > { %173 = vst [vmem:[#allocation4 + $0x70] sm:$0xff] %v3478_v0  ;;  %174 = vst [vmem:[#allocation4 + $0x78] sm:$0xff] %v3478_v0 }
  0x5f   : > { %175 = vst [vmem:[#allocation4 + $0x80] sm:$0xff] %v3478_v0 }
  0x60 PF: > { %v178_v1 = vlaneseq  ;;  %v360_v2 = vld [vmem:[#allocation2 + $0x8] sm:$0xff]  ;;  %v362_v3 = vld [vmem:[#allocation2 + $0x18] sm:$0xff]  ;;  %v359_v5 = vld [vmem:[#allocation2] sm:$0xff]  ;;  %v3479_v8 = vmov 0.0   ;;  %p3124_p10 = scmp.ne.s32.totalorder %s3524_s16, 1 }
  0x61   : > { %v3132_v4 = vpack.c.bf16 %v362_v3, %v360_v2  ;;  %v361_v6 = vld [vmem:[#allocation2 + $0x10] sm:$0xff]  ;;  %v364_v7 = vld [vmem:[#allocation2 + $0x28] sm:$0xff]  ;;  %760 = vmatprep.mubr.f32.mxu0 %v3479_v8  ;;  %1532 = vmatprep.mubr.f32.mxu1 %v3479_v8  ;;  %v366_v11 = vld [vmem:[#allocation2 + $0x38] sm:$0xff] }
  0x62   : > { %v3623_v9 = vshrl.u32 %v178_v1, 7  ;;  %v3134_v10 = vpack.c.bf16 %v361_v6, %v359_v5  ;;  %v363_v12 = vld [vmem:[#allocation2 + $0x20] sm:$0xff]  ;;  %v365_v13 = vld [vmem:[#allocation2 + $0x30] sm:$0xff]  ;;  %v3626_v14 = vld [vmem:[%s3590_s25] sm:$0x77]  ;;  %v3136_v15 = vpack.c.bf16 %v366_v11, %v364_v7 }
  0x63   : > { %3133 = vmatprep.subr.bf16.mxu0 %v3132_v4  ;;  %v3138_v19 = vpack.c.bf16 %v365_v13, %v363_v12  ;;  %v368_v20 = vld [vmem:[#allocation2 + $0x48] sm:$0xff]  ;;  %v370_v25 = vld [vmem:[#allocation2 + $0x58] sm:$0xff]  ;;  %v1145_v27 = vld [vmem:[#allocation3] sm:$0xff] }
  0x64   : > { %v3629_v16 = vsub.s32 0, %v3623_v9  ;;  %v3632_v17 = vsub.s32 1, %v3623_v9  ;;  %v3635_v18 = vsub.s32 2, %v3623_v9  ;;  %3135 = vmatpush1.bf16.msra.mxu0 %v3134_v10  ;;  %v3644_v24 = vadd.s32 8, %v3623_v9  ;;  %v1146_v26 = vld [vmem:[#allocation3 + $0x8] sm:$0xff]  ;;  %v367_v37 = vld [vmem:[#allocation2 + $0x40] sm:$0xff] }
  0x65   : > { %3137 = vmatprep.subr.bf16.mxu0 %v3136_v15  ;;  %1468 = vmatprep.subr.mxu1 %v1146_v26  ;;  %v3140_v31 = vpack.c.bf16 %v370_v25, %v368_v20  ;;  %v3655_v32 = vadd.s32 16, %v3623_v9  ;;  %v3662_v36 = vadd.s32 24, %v3623_v9  ;;  %v369_v38 = vld [vmem:[#allocation2 + $0x50] sm:$0xff]  ;;  %v372_v39 = vld [vmem:[#allocation2 + $0x68] sm:$0xff]  ;;  %v374_v40 = vld [vmem:[#allocation2 + $0x78] sm:$0xff]  ;;  %v193_v42 = vsub.s32 4, %v3623_v9 }
  0x66   : > { %v318_v21 = vrot.slane %v3626_v14, %v3632_v17  ;;  %v2121_v22 = vrot.slane %v3626_v14, %v3635_v18  ;;  %v190_v23 = vrot.slane %v3626_v14, %v3629_v16  ;;  %1469 = vmatpush1.msra.mxu1 %v1145_v27  ;;  %v3668_v43 = vadd.s32 32, %v3623_v9  ;;  %v371_v44 = vld [vmem:[#allocation2 + $0x60] sm:$0xff]  ;;  %v373_v45 = vld [vmem:[#allocation2 + $0x70] sm:$0xff] }
  0x67   : > { %v2124_v46 = vsub.s32 6, %v3623_v9  ;;  %v3142_v47 = vpack.c.bf16 %v369_v38, %v367_v37  ;;  %v3144_v48 = vpack.c.bf16 %v374_v40, %v372_v39  ;;  %v3672_v49 = vld [vmem:[%s3590_s25 + $0x8] sm:$0x77]  ;;  %v3146_v52 = vpack.c.bf16 %v373_v45, %v371_v44 }
  0x68   : > { %v334_v28 = vrot.slane %v318_v21, %v3632_v17  ;;  %v3648_v29 = vrot.slane %v2121_v22, %v3635_v18  ;;  %v206_v30 = vrot.slane %v190_v23, %v3629_v16  ;;  %3139 = vmatpush1.bf16.msra.mxu0 %v3138_v19  ;;  %v202_v50 = vrot.slane %v3672_v49, %v193_v42 }
  0x69   : > { %3141 = vmatprep.subr.bf16.mxu0 %v3140_v31  ;;  %v2129_v53 = vrot.slane %v3672_v49, %v3635_v18  ;;  %v2133_v54 = vrot.slane %v3672_v49, %v2124_v46  ;;  %v3683_v55 = vadd.s32 40, %v3623_v9  ;;  %v3697_v60 = vadd.s32 48, %v3623_v9 }
  0x6a   : > { %vm347_vm0 = vcmp.eq.s32.totalorder %v3623_v9, %v334_v28  ;;  %vm219_vm1 = vcmp.eq.s32.totalorder %v3623_v9, %v206_v30  ;;  %vm223_vm2 = vcmp.eq.s32.totalorder %v3644_v24, %v206_v30  ;;  %vm227_vm3 = vcmp.eq.s32.totalorder %v3655_v32, %v206_v30 }
  0x6b   : > { %v2856_v33 = vsel %vm347_vm0, 1.0, %v3479_v8  ;;  %v2824_v34 = vsel %vm219_vm1, 1.0, %v3479_v8  ;;  %v2828_v35 = vsel %vm223_vm2, 1.0, %v3479_v8  ;;  %v2832_v41 = vsel %vm227_vm3, 1.0, %v3479_v8 }
  0x6c   : > { %1147 = vxpose.xlu1.b32.start.end [1/1] (short) %v2856_v33, 128  ;;  %375 = vxpose.xlu0.b32.start [1/8] (short) %v2824_v34, 128  ;;  %vm231_vm4 = vcmp.eq.s32.totalorder %v3662_v36, %v206_v30  ;;  %vm235_vm5 = vcmp.eq.s32.totalorder %v3668_v43, %v206_v30  ;;  %v3686_v56 = vrot.slane %v202_v50, %v3629_v16  ;;  %v3702_v62 = vadd.s32 56, %v3623_v9 }
  0x6d   : > { %v2836_v51 = vsel %vm231_vm4, 1.0, %v3479_v8  ;;  %3143 = vmatpush1.bf16.msra.mxu0 %v3142_v47  ;;  %v3689_v57 = vrot.slane %v2129_v53, %v3635_v18  ;;  %v3692_v58 = vrot.slane %v2133_v54, %v3635_v18  ;;  %v2840_v59 = vsel %vm235_vm5, 1.0, %v3479_v8 }
  0x6e   : > { %3145 = vmatprep.subr.bf16.mxu0 %v3144_v48  ;;  %vm239_vm6 = vcmp.eq.s32.totalorder %v3683_v55, %v206_v30  ;;  %vm243_vm7 = vcmp.eq.s32.totalorder %v3697_v60, %v206_v30  ;;  %vm247_vm8 = vcmp.eq.s32.totalorder %v3702_v62, %v206_v30  ;;  %v321_v1 = vsub.s32 5, %v3623_v9 }
  0x6f   : > { %v2844_v61 = vsel %vm239_vm6, 1.0, %v3479_v8  ;;  %v2848_v63 = vsel %vm243_vm7, 1.0, %v3479_v8  ;;  %v2852_v0 = vsel %vm247_vm8, 1.0, %v3479_v8  ;;  %v194_v2 = vrot.slane %v3626_v14, %v193_v42 }
  0x70   : > { %376 = vxpose.xlu0.b32.cont [2/8] (short) %v2828_v35, 128  ;;  %v322_v3 = vrot.slane %v3626_v14, %v321_v1  ;;  %v198_v20 = vrot.slane %v3672_v49, %v3629_v16  ;;  %v326_v21 = vrot.slane %v3672_v49, %v3632_v17  ;;  %vm503_vm6 = vcmask 523264  }
  0x71   : > { %3147 = vmatpush1.bf16.msra.mxu0 %v3146_v52  ;;  %v210_v4 = vrot.slane %v194_v2, %v3629_v16  ;;  %vm1275_vm7 = vcmask 64512  }
  0x72   : > { %v338_v5 = vrot.slane %v322_v3, %v3632_v17  ;;  %v214_v22 = vrot.slane %v198_v20, %v3629_v16  ;;  %v342_v23 = vrot.slane %v326_v21, %v3632_v17 }
  0x73   : > { %vm220_vm9 = vcmp.eq.s32.totalorder %v3623_v9, %v210_v4  ;;  %vm224_vm11 = vcmp.eq.s32.totalorder %v3644_v24, %v210_v4  ;;  %vm228_vm12 = vcmp.eq.s32.totalorder %v3655_v32, %v210_v4  ;;  %vm232_vm13 = vcmp.eq.s32.totalorder %v3662_v36, %v210_v4 }
  0x74   : > { %377 = vxpose.xlu0.b32.cont [3/8] (short) %v2832_v41, 128  ;;  %vm348_vm10 = vcmp.eq.s32.totalorder %v3623_v9, %v338_v5  ;;  %v2825_v6 = vsel %vm220_vm9, 1.0, %v3479_v8  ;;  %v2829_v10 = vsel %vm224_vm11, 1.0, %v3479_v8  ;;  %v2833_v11 = vsel %vm228_vm12, 1.0, %v3479_v8 }
  0x75   : > { %v2857_v7 = vsel %vm348_vm10, 1.0, %v3479_v8  ;;  %v2837_v12 = vsel %vm232_vm13, 1.0, %v3479_v8  ;;  %vm236_vm14 = vcmp.eq.s32.totalorder %v3668_v43, %v210_v4  ;;  %vm240_vm15 = vcmp.eq.s32.totalorder %v3683_v55, %v210_v4 }
  0x76   : > { %v2841_v13 = vsel %vm236_vm14, 1.0, %v3479_v8  ;;  %v2845_v14 = vsel %vm240_vm15, 1.0, %v3479_v8  ;;  %vm244_vm0 = vcmp.eq.s32.totalorder %v3697_v60, %v210_v4  ;;  %vm248_vm1 = vcmp.eq.s32.totalorder %v3702_v62, %v210_v4 }
  0x77   : > { %v2849_v15 = vsel %vm244_vm0, 1.0, %v3479_v8  ;;  %v2853_v19 = vsel %vm248_vm1, 1.0, %v3479_v8  ;;  %vm349_vm2 = vcmp.eq.s32.totalorder %v3623_v9, %v342_v23  ;;  %vm221_vm3 = vcmp.eq.s32.totalorder %v3623_v9, %v214_v22 }
  0x78   : > { %378 = vxpose.xlu0.b32.cont [4/8] (short) %v2836_v51, 128  ;;  %v2858_v25 = vsel %vm349_vm2, 1.0, %v3479_v8  ;;  %v2826_v26 = vsel %vm221_vm3, 1.0, %v3479_v8  ;;  %vm225_vm4 = vcmp.eq.s32.totalorder %v3644_v24, %v214_v22  ;;  %vm229_vm5 = vcmp.eq.s32.totalorder %v3655_v32, %v214_v22 }
  0x79   : > { %v2830_v27 = vsel %vm225_vm4, 1.0, %v3479_v8  ;;  %v2834_v30 = vsel %vm229_vm5, 1.0, %v3479_v8  ;;  %vm233_vm8 = vcmp.eq.s32.totalorder %v3662_v36, %v214_v22  ;;  %vm237_vm9 = vcmp.eq.s32.totalorder %v3668_v43, %v214_v22 }
  0x7a   : > { %v2838_v34 = vsel %vm233_vm8, 1.0, %v3479_v8  ;;  %v2842_v38 = vsel %vm237_vm9, 1.0, %v3479_v8  ;;  %vm241_vm10 = vcmp.eq.s32.totalorder %v3683_v55, %v214_v22  ;;  %vm245_vm11 = vcmp.eq.s32.totalorder %v3697_v60, %v214_v22 }
  0x7b   : > { %v2846_v41 = vsel %vm241_vm10, 1.0, %v3479_v8  ;;  %v2850_v45 = vsel %vm245_vm11, 1.0, %v3479_v8  ;;  %vm249_vm12 = vcmp.eq.s32.totalorder %v3702_v62, %v214_v22  ;;  %v330_v4 = vrot.slane %v3672_v49, %v321_v1 }
  0x7c   : > { %379 = vxpose.xlu0.b32.cont [5/8] (short) %v2840_v59, 128  ;;  %v2854_v50 = vsel %vm249_vm12, 1.0, %v3479_v8  ;;  %vm222_vm13 = vcmp.eq.s32.totalorder %v3623_v9, %v3686_v56  ;;  %vm226_vm15 = vcmp.eq.s32.totalorder %v3644_v24, %v3686_v56  ;;  %vm230_vm0 = vcmp.eq.s32.totalorder %v3655_v32, %v3686_v56 }
  0x7d   : > { %v2835_v21 = vsel %vm230_vm0, 1.0, %v3479_v8  ;;  %vm234_vm1 = vcmp.eq.s32.totalorder %v3662_v36, %v3686_v56  ;;  %vm238_vm2 = vcmp.eq.s32.totalorder %v3668_v43, %v3686_v56  ;;  %vm242_vm3 = vcmp.eq.s32.totalorder %v3683_v55, %v3686_v56 }
  0x7e   : > { %vm246_vm4 = vcmp.eq.s32.totalorder %v3697_v60, %v3686_v56  ;;  %vm250_vm5 = vcmp.eq.s32.totalorder %v3702_v62, %v3686_v56  ;;  %vm2153_vm9 = vcmp.eq.s32.totalorder %v3623_v9, %v3692_v58  ;;  %vm2154_vm10 = vcmp.eq.s32.totalorder %v3644_v24, %v3648_v29 }
  0x7f   : > { %vm2158_vm12 = vcmp.eq.s32.totalorder %v3655_v32, %v3648_v29  ;;  %vm2166_vm0 = vcmp.eq.s32.totalorder %v3668_v43, %v3648_v29 }
  0x80   : > { %380 = vxpose.xlu0.b32.cont [6/8] (short) %v2844_v61, 128 }
  0x84   : > { %381 = vxpose.xlu0.b32.cont [7/8] (short) %v2848_v63, 128 }
  0x88   : > { %382 = vxpose.xlu0.b32.end [8/8] (short) %v2852_v0, 128 }
  0xa9   : > { %407 = vxpose.xlu1.b32.start [1/8] (short) %v2825_v6, 128  ;;  %1179 = vxpose.xlu0.b32.start.end [1/1] (short) %v2857_v7, 128  ;;  %v346_v7 = vrot.slane %v330_v4, %v3632_v17  ;;  %v2827_v17 = vsel %vm222_vm13, 1.0, %v3479_v8 }
  0xab   : > { %vm350_vm14 = vcmp.eq.s32.totalorder %v3623_v9, %v346_v7 }
  0xad   : > { %408 = vxpose.xlu1.b32.cont [2/8] (short) %v2829_v10, 128 }
  0xb1   : > { %409 = vxpose.xlu1.b32.cont [3/8] (short) %v2833_v11, 128 }
  0xb5   : > { %410 = vxpose.xlu1.b32.cont [4/8] (short) %v2837_v12, 128  ;;  %v2859_v12 = vsel %vm350_vm14, 1.0, %v3479_v8  ;;  %vm2162_vm14 = vcmp.eq.s32.totalorder %v3662_v36, %v3648_v29 }
  0xb9   : > { %411 = vxpose.xlu1.b32.cont [5/8] (short) %v2841_v13, 128 }
  0xbd   : > { %412 = vxpose.xlu1.b32.cont [6/8] (short) %v2845_v14, 128 }
  0xc1   : > { %413 = vxpose.xlu1.b32.cont [7/8] (short) %v2849_v15, 128  ;;  %v2831_v15 = vsel %vm226_vm15, 1.0, %v3479_v8 }
  0xc5   : > { %414 = vxpose.xlu1.b32.end [8/8] (short) %v2853_v19, 128 }
  0xe6   : > { %1211 = vxpose.xlu1.b32.start.end [1/1] (short) %v2858_v25, 128  ;;  %439 = vxpose.xlu0.b32.start [1/8] (short) %v2826_v26, 128  ;;  %v2839_v25 = vsel %vm234_vm1, 1.0, %v3479_v8 }
  0xea   : > { %440 = vxpose.xlu0.b32.cont [2/8] (short) %v2830_v27, 128 }
  0xec   : > { %v1163_v16 = vpop.trf.xlu1  ;;  %v391_v28 = vpop.trf.xlu0 }
  0xed   : > { %2860 = vmatmul.mubr.msk.f32.vlgmr.msra.gmra.mrb[0].mxu0 %vm503_vm6, %v391_v28  ;;  %2924 = vmatmul.mubr.msk.f32.vlgmr.msra.gmra.mrb[0].mxu1 %vm1275_vm7, %v1163_v16  ;;  %v2843_v16 = vsel %vm238_vm2, 1.0, %v3479_v8  ;;  %vm2170_vm2 = vcmp.eq.s32.totalorder %v3683_v55, %v3648_v29 }
  0xee   : > { %1538 = vmatprep.mubr.f32.mxu1 %v3479_v8  ;;  %766 = vmatprep.mubr.f32.mxu0 %v3479_v8 }
  0xef   : > { %441 = vxpose.xlu0.b32.cont [3/8] (short) %v2834_v30, 128 }
  0xf0   : > { %v1164_v31 = vpop.trf.xlu1  ;;  %v392_v33 = vpop.trf.xlu0 }
  0xf1   : > { %2861 = vmatmul.mubr.msk.f32.gmra.mrb[2].mxu0 %vm503_vm6, %v392_v33  ;;  %2925 = vmatmul.mubr.msk.f32.gmra.mrb[2].mxu1 %vm1275_vm7, %v1164_v31  ;;  %v2847_v31 = vsel %vm242_vm3, 1.0, %v3479_v8 }
  0xf2   : > { %1544 = vmatprep.mubr.f32.mxu1 %v3479_v8  ;;  %772 = vmatprep.mubr.f32.mxu0 %v3479_v8 }
  0xf3   : > { %442 = vxpose.xlu0.b32.cont [4/8] (short) %v2838_v34, 128 }
  0xf4   : > { %v1165_v35 = vpop.trf.xlu1  ;;  %v393_v37 = vpop.trf.xlu0 }
  0xf5   : > { %2862 = vmatmul.mubr.msk.f32.gmra.mrb[4].mxu0 %vm503_vm6, %v393_v37  ;;  %2926 = vmatmul.mubr.msk.f32.gmra.mrb[4].mxu1 %vm1275_vm7, %v1165_v35  ;;  %v2851_v35 = vsel %vm246_vm4, 1.0, %v3479_v8  ;;  %vm2174_vm4 = vcmp.eq.s32.totalorder %v3697_v60, %v3648_v29 }
  0xf6   : > { %1550 = vmatprep.mubr.f32.mxu1 %v3479_v8  ;;  %778 = vmatprep.mubr.f32.mxu0 %v3479_v8 }
  0xf7   : > { %443 = vxpose.xlu0.b32.cont [5/8] (short) %v2842_v38, 128 }
  0xf8   : > { %v1166_v39 = vpop.trf.xlu1  ;;  %v394_v40 = vpop.trf.xlu0 }
  0xf9   : > { %2863 = vmatmul.mubr.msk.f32.gmra.mrb[6].mxu0 %vm503_vm6, %v394_v40  ;;  %2927 = vmatmul.mubr.msk.f32.gmra.mrb[6].mxu1 %vm1275_vm7, %v1166_v39  ;;  %v2855_v39 = vsel %vm250_vm5, 1.0, %v3479_v8 }
  0xfa   : > { %1556 = vmatprep.mubr.f32.mxu1 %v3479_v8  ;;  %784 = vmatprep.mubr.f32.mxu0 %v3479_v8 }
  0xfb   : > { %444 = vxpose.xlu0.b32.cont [6/8] (short) %v2846_v41, 128 }
  0xfc   : > { %v1167_v42 = vpop.trf.xlu1  ;;  %v395_v44 = vpop.trf.xlu0 }
  0xfd   : > { %2864 = vmatmul.mubr.msk.f32.gmra.mrb[8].mxu0 %vm503_vm6, %v395_v44  ;;  %2928 = vmatmul.mubr.msk.f32.gmra.mrb[8].mxu1 %vm1275_vm7, %v1167_v42 }
  0xfe   : > { %1562 = vmatprep.mubr.f32.mxu1 %v3479_v8  ;;  %790 = vmatprep.mubr.f32.mxu0 %v3479_v8 }
  0xff   : > { %445 = vxpose.xlu0.b32.cont [7/8] (short) %v2850_v45, 128 }
 0x100   : > { %v1168_v47 = vpop.trf.xlu1  ;;  %v396_v48 = vpop.trf.xlu0 }
 0x101   : > { %2865 = vmatmul.mubr.msk.f32.gmra.mrb[10].mxu0 %vm503_vm6, %v396_v48  ;;  %2929 = vmatmul.mubr.msk.f32.gmra.mrb[10].mxu1 %vm1275_vm7, %v1168_v47  ;;  %v3480_v47 = vmov 0.0|0.0  }
 0x102   : > { %1568 = vmatprep.mubr.f32.mxu1 %v3479_v8  ;;  %796 = vmatprep.mubr.f32.mxu0 %v3479_v8 }
 0x103   : > { %446 = vxpose.xlu0.b32.end [8/8] (short) %v2854_v50, 128  ;;  %3148 = vmatprep.subr.bf16.mxu1 %v3480_v47 }
 0x104   : > { %v1169_v51 = vpop.trf.xlu1  ;;  %v397_v52 = vpop.trf.xlu0  ;;  %3196 = vmatprep.subr.bf16.mxu0 %v3480_v47 }
 0x105   : > { %2866 = vmatmul.mubr.msk.f32.gmra.mrb[12].mxu0 %vm503_vm6, %v397_v52  ;;  %2930 = vmatmul.mubr.msk.f32.gmra.mrb[12].mxu1 %vm1275_vm7, %v1169_v51 }
 0x106   : > { %1574 = vmatprep.mubr.f32.mxu1 %v3479_v8  ;;  %802 = vmatprep.mubr.f32.mxu0 %v3479_v8 }
 0x108   : > { %v1170_v53 = vpop.trf.xlu1  ;;  %v398_v54 = vpop.trf.xlu0 }
 0x109   : > { %2867 = vmatmul.mubr.msk.f32.gmra.mrb[14].mxu0 %vm503_vm6, %v398_v54  ;;  %2931 = vmatmul.mubr.msk.f32.gmra.mrb[14].mxu1 %vm1275_vm7, %v1170_v53 }
 0x10a   : > { %1580 = vmatprep.mubr.f32.mxu1 %v3479_v8  ;;  %808 = vmatprep.mubr.f32.mxu0 %v3479_v8 }
 0x10c   : > { %v1171_v59 = vpop.trf.xlu1  ;;  %v399_v61 = vpop.trf.xlu0 }
 0x10d   : > { %2868 = vmatmul.mubr.msk.f32.gmra.mrb[16].mxu0 %vm503_vm6, %v399_v61  ;;  %2932 = vmatmul.mubr.msk.f32.gmra.mrb[16].mxu1 %vm1275_vm7, %v1171_v59 }
 0x10e   : > { %1586 = vmatprep.mubr.f32.mxu1 %v3479_v8  ;;  %814 = vmatprep.mubr.f32.mxu0 %v3479_v8 }
 0x110   : > { %v1172_v63 = vpop.trf.xlu1  ;;  %v400_v0 = vpop.trf.xlu0 }
 0x111   : > { %2869 = vmatmul.mubr.msk.f32.gmra.mrb[18].mxu0 %vm503_vm6, %v400_v0  ;;  %2933 = vmatmul.mubr.msk.f32.gmra.mrb[18].mxu1 %vm1275_vm7, %v1172_v63 }
 0x112   : > { %1592 = vmatprep.mubr.f32.mxu1 %v3479_v8  ;;  %820 = vmatprep.mubr.f32.mxu0 %v3479_v8 }
 0x114   : > { %v1173_v2 = vpop.trf.xlu1  ;;  %v401_v3 = vpop.trf.xlu0 }
 0x115   : > { %2870 = vmatmul.mubr.msk.f32.gmra.mrb[20].mxu0 %vm503_vm6, %v401_v3  ;;  %2934 = vmatmul.mubr.msk.f32.gmra.mrb[20].mxu1 %vm1275_vm7, %v1173_v2 }
 0x116   : > { %1598 = vmatprep.mubr.f32.mxu1 %v3479_v8  ;;  %826 = vmatprep.mubr.f32.mxu0 %v3479_v8 }
 0x118   : > { %v1174_v5 = vpop.trf.xlu1  ;;  %v402_v6 = vpop.trf.xlu0 }
 0x119   : > { %2871 = vmatmul.mubr.msk.f32.gmra.mrb[22].mxu0 %vm503_vm6, %v402_v6  ;;  %2935 = vmatmul.mubr.msk.f32.gmra.mrb[22].mxu1 %vm1275_vm7, %v1174_v5 }
 0x11a   : > { %1604 = vmatprep.mubr.f32.mxu1 %v3479_v8  ;;  %832 = vmatprep.mubr.f32.mxu0 %v3479_v8 }
 0x11c   : > { %v1175_v10 = vpop.trf.xlu1  ;;  %v403_v11 = vpop.trf.xlu0 }
 0x11d   : > { %2872 = vmatmul.mubr.msk.f32.gmra.mrb[24].mxu0 %vm503_vm6, %v403_v11  ;;  %2936 = vmatmul.mubr.msk.f32.gmra.mrb[24].mxu1 %vm1275_vm7, %v1175_v10 }
 0x11e   : > { %1610 = vmatprep.mubr.f32.mxu1 %v3479_v8  ;;  %838 = vmatprep.mubr.f32.mxu0 %v3479_v8 }
 0x120   : > { %v1176_v49 = vpop.trf.xlu1  ;;  %v404_v1 = vpop.trf.xlu0 }
 0x121   : > { %2873 = vmatmul.mubr.msk.f32.gmra.mrb[26].mxu0 %vm503_vm6, %v404_v1  ;;  %2937 = vmatmul.mubr.msk.f32.gmra.mrb[26].mxu1 %vm1275_vm7, %v1176_v49 }
 0x122   : > { %1616 = vmatprep.mubr.f32.mxu1 %v3479_v8  ;;  %844 = vmatprep.mubr.f32.mxu0 %v3479_v8 }
 0x124   : > { %v1177_v13 = vpop.trf.xlu1  ;;  %v405_v14 = vpop.trf.xlu0  ;;  %471 = vxpose.xlu1.b32.start [1/8] (short) %v2827_v17, 128  ;;  %1243 = vxpose.xlu0.b32.start.end [1/1] (short) %v2859_v12, 128 }
 0x125   : > { %2874 = vmatmul.mubr.msk.f32.gmra.mrb[28].mxu0 %vm503_vm6, %v405_v14  ;;  %2938 = vmatmul.mubr.msk.f32.gmra.mrb[28].mxu1 %vm1275_vm7, %v1177_v13 }
 0x126   : > { %1622 = vmatprep.mubr.f32.mxu1 %v3479_v8  ;;  %850 = vmatprep.mubr.f32.mxu0 %v3479_v8 }
 0x128   : > { %v1178_v19 = vpop.trf.xlu1  ;;  %v406_v20 = vpop.trf.xlu0  ;;  %472 = vxpose.xlu1.b32.cont [2/8] (short) %v2831_v15, 128 }
 0x129   : > { %2875 = vmatmul.mubr.msk.f32.gmra.mrb[30].mxu0 %vm503_vm6, %v406_v20  ;;  %2939 = vmatmul.mubr.msk.f32.gmra.mrb[30].mxu1 %vm1275_vm7, %v1178_v19 }
 0x12a   : > { %1628 = vmatprep.mubr.f32.mxu1 %v3479_v8  ;;  %856 = vmatprep.mubr.f32.mxu0 %v3479_v8 }
 0x12c   : > { %v423_v22 = vpop.trf.xlu1  ;;  %v1195_v23 = vpop.trf.xlu0  ;;  %473 = vxpose.xlu1.b32.cont [3/8] (short) %v2835_v21, 128 }
 0x12d   : > { %2876 = vmatmul.mubr.msk.f32.gmra.mrb[32].mxu0 %vm503_vm6, %v423_v22  ;;  %2940 = vmatmul.mubr.msk.f32.gmra.mrb[32].mxu1 %vm1275_vm7, %v1195_v23 }
 0x12e   : > { %862 = vmatprep.mubr.f32.mxu0 %v3479_v8  ;;  %1634 = vmatprep.mubr.f32.mxu1 %v3479_v8 }
 0x130   : > { %v424_v26 = vpop.trf.xlu1  ;;  %v1196_v27 = vpop.trf.xlu0  ;;  %474 = vxpose.xlu1.b32.cont [4/8] (short) %v2839_v25, 128 }
 0x131   : > { %2877 = vmatmul.mubr.msk.f32.gmra.mrb[34].mxu0 %vm503_vm6, %v424_v26  ;;  %2941 = vmatmul.mubr.msk.f32.gmra.mrb[34].mxu1 %vm1275_vm7, %v1196_v27 }
 0x132   : > { %868 = vmatprep.mubr.f32.mxu0 %v3479_v8  ;;  %1640 = vmatprep.mubr.f32.mxu1 %v3479_v8 }
 0x134   : > { %v425_v28 = vpop.trf.xlu1  ;;  %v1197_v30 = vpop.trf.xlu0  ;;  %475 = vxpose.xlu1.b32.cont [5/8] (short) %v2843_v16, 128 }
 0x135   : > { %2878 = vmatmul.mubr.msk.f32.gmra.mrb[36].mxu0 %vm503_vm6, %v425_v28  ;;  %2942 = vmatmul.mubr.msk.f32.gmra.mrb[36].mxu1 %vm1275_vm7, %v1197_v30 }
 0x136   : > { %874 = vmatprep.mubr.f32.mxu0 %v3479_v8  ;;  %1646 = vmatprep.mubr.f32.mxu1 %v3479_v8 }
 0x138   : > { %v426_v33 = vpop.trf.xlu1  ;;  %v1198_v34 = vpop.trf.xlu0  ;;  %476 = vxpose.xlu1.b32.cont [6/8] (short) %v2847_v31, 128 }
 0x139   : > { %2879 = vmatmul.mubr.msk.f32.gmra.mrb[38].mxu0 %vm503_vm6, %v426_v33  ;;  %2943 = vmatmul.mubr.msk.f32.gmra.mrb[38].mxu1 %vm1275_vm7, %v1198_v34 }
 0x13a   : > { %880 = vmatprep.mubr.f32.mxu0 %v3479_v8  ;;  %1652 = vmatprep.mubr.f32.mxu1 %v3479_v8 }
 0x13c   : > { %v427_v37 = vpop.trf.xlu1  ;;  %v1199_v38 = vpop.trf.xlu0  ;;  %477 = vxpose.xlu1.b32.cont [7/8] (short) %v2851_v35, 128 }
 0x13d   : > { %2880 = vmatmul.mubr.msk.f32.gmra.mrb[40].mxu0 %vm503_vm6, %v427_v37  ;;  %2944 = vmatmul.mubr.msk.f32.gmra.mrb[40].mxu1 %vm1275_vm7, %v1199_v38 }
 0x13e   : > { %886 = vmatprep.mubr.f32.mxu0 %v3479_v8  ;;  %1658 = vmatprep.mubr.f32.mxu1 %v3479_v8 }
 0x140   : > { %v428_v40 = vpop.trf.xlu1  ;;  %v1200_v41 = vpop.trf.xlu0  ;;  %478 = vxpose.xlu1.b32.end [8/8] (short) %v2855_v39, 128 }
 0x141   : > { %2881 = vmatmul.mubr.msk.f32.gmra.mrb[42].mxu0 %vm503_vm6, %v428_v40  ;;  %2945 = vmatmul.mubr.msk.f32.gmra.mrb[42].mxu1 %vm1275_vm7, %v1200_v41 }
 0x142   : > { %892 = vmatprep.mubr.f32.mxu0 %v3479_v8  ;;  %1664 = vmatprep.mubr.f32.mxu1 %v3479_v8 }
 0x144   : > { %v429_v56 = vpop.trf.xlu1  ;;  %v1201_v42 = vpop.trf.xlu0 }
 0x145   : > { %2882 = vmatmul.mubr.msk.f32.gmra.mrb[44].mxu0 %vm503_vm6, %v429_v56  ;;  %2946 = vmatmul.mubr.msk.f32.gmra.mrb[44].mxu1 %vm1275_vm7, %v1201_v42 }
 0x146   : > { %898 = vmatprep.mubr.f32.mxu0 %v3479_v8  ;;  %1670 = vmatprep.mubr.f32.mxu1 %v3479_v8 }
 0x148   : > { %v430_v44 = vpop.trf.xlu1  ;;  %v1202_v45 = vpop.trf.xlu0 }
 0x149   : > { %2883 = vmatmul.mubr.msk.f32.gmra.mrb[46].mxu0 %vm503_vm6, %v430_v44  ;;  %2947 = vmatmul.mubr.msk.f32.gmra.mrb[46].mxu1 %vm1275_vm7, %v1202_v45 }
 0x14a   : > { %904 = vmatprep.mubr.f32.mxu0 %v3479_v8  ;;  %1676 = vmatprep.mubr.f32.mxu1 %v3479_v8 }
 0x14c   : > { %v431_v48 = vpop.trf.xlu1  ;;  %v1203_v50 = vpop.trf.xlu0 }
 0x14d   : > { %2884 = vmatmul.mubr.msk.f32.gmra.mrb[48].mxu0 %vm503_vm6, %v431_v48  ;;  %2948 = vmatmul.mubr.msk.f32.gmra.mrb[48].mxu1 %vm1275_vm7, %v1203_v50 }
 0x14e   : > { %910 = vmatprep.mubr.f32.mxu0 %v3479_v8  ;;  %1682 = vmatprep.mubr.f32.mxu1 %v3479_v8 }
 0x150   : > { %v432_v51 = vpop.trf.xlu1  ;;  %v1204_v52 = vpop.trf.xlu0 }
 0x151   : > { %2885 = vmatmul.mubr.msk.f32.gmra.mrb[50].mxu0 %vm503_vm6, %v432_v51  ;;  %2949 = vmatmul.mubr.msk.f32.gmra.mrb[50].mxu1 %vm1275_vm7, %v1204_v52 }
 0x152   : > { %916 = vmatprep.mubr.f32.mxu0 %v3479_v8  ;;  %1688 = vmatprep.mubr.f32.mxu1 %v3479_v8 }
 0x154   : > { %v433_v53 = vpop.trf.xlu1  ;;  %v1205_v54 = vpop.trf.xlu0 }
 0x155   : > { %2886 = vmatmul.mubr.msk.f32.gmra.mrb[52].mxu0 %vm503_vm6, %v433_v53  ;;  %2950 = vmatmul.mubr.msk.f32.gmra.mrb[52].mxu1 %vm1275_vm7, %v1205_v54 }
 0x156   : > { %922 = vmatprep.mubr.f32.mxu0 %v3479_v8  ;;  %1694 = vmatprep.mubr.f32.mxu1 %v3479_v8 }
 0x158   : > { %v434_v59 = vpop.trf.xlu1  ;;  %v1206_v61 = vpop.trf.xlu0 }
 0x159   : > { %2887 = vmatmul.mubr.msk.f32.gmra.mrb[54].mxu0 %vm503_vm6, %v434_v59  ;;  %2951 = vmatmul.mubr.msk.f32.gmra.mrb[54].mxu1 %vm1275_vm7, %v1206_v61 }
 0x15a   : > { %928 = vmatprep.mubr.f32.mxu0 %v3479_v8  ;;  %1700 = vmatprep.mubr.f32.mxu1 %v3479_v8 }
 0x15c   : > { %v435_v63 = vpop.trf.xlu1  ;;  %v1207_v0 = vpop.trf.xlu0 }
 0x15d   : > { %2888 = vmatmul.mubr.msk.f32.gmra.mrb[56].mxu0 %vm503_vm6, %v435_v63  ;;  %2952 = vmatmul.mubr.msk.f32.gmra.mrb[56].mxu1 %vm1275_vm7, %v1207_v0 }
 0x15e   : > { %934 = vmatprep.mubr.f32.mxu0 %v3479_v8  ;;  %1706 = vmatprep.mubr.f32.mxu1 %v3479_v8 }
 0x160   : > { %v436_v2 = vpop.trf.xlu1  ;;  %v1208_v3 = vpop.trf.xlu0 }
 0x161   : > { %2889 = vmatmul.mubr.msk.f32.gmra.mrb[58].mxu0 %vm503_vm6, %v436_v2  ;;  %2953 = vmatmul.mubr.msk.f32.gmra.mrb[58].mxu1 %vm1275_vm7, %v1208_v3 }
 0x162   : > { %940 = vmatprep.mubr.f32.mxu0 %v3479_v8  ;;  %1712 = vmatprep.mubr.f32.mxu1 %v3479_v8 }
 0x164   : > { %v437_v4 = vpop.trf.xlu1  ;;  %v1209_v5 = vpop.trf.xlu0 }
 0x165   : > { %2890 = vmatmul.mubr.msk.f32.gmra.mrb[60].mxu0 %vm503_vm6, %v437_v4  ;;  %2954 = vmatmul.mubr.msk.f32.gmra.mrb[60].mxu1 %vm1275_vm7, %v1209_v5 }
 0x166   : > { %946 = vmatprep.mubr.f32.mxu0 %v3479_v8  ;;  %1718 = vmatprep.mubr.f32.mxu1 %v3479_v8 }
 0x168   : > { %v438_v6 = vpop.trf.xlu1  ;;  %v1210_v7 = vpop.trf.xlu0 }
 0x169   : > { %2891 = vmatmul.mubr.msk.f32.gmra.mrb[62].mxu0 %vm503_vm6, %v438_v6  ;;  %2955 = vmatmul.mubr.msk.f32.gmra.mrb[62].mxu1 %vm1275_vm7, %v1210_v7 }
 0x16a   : > { %952 = vmatprep.mubr.f32.mxu0 %v3479_v8  ;;  %1724 = vmatprep.mubr.f32.mxu1 %v3479_v8 }
 0x16c   : > { %v1227_v10 = vpop.trf.xlu1  ;;  %v455_v11 = vpop.trf.xlu0 }
 0x16d   : > { %2892 = vmatmul.mubr.msk.f32.gmra.mrb[64].mxu0 %vm503_vm6, %v455_v11  ;;  %2956 = vmatmul.mubr.msk.f32.gmra.mrb[64].mxu1 %vm1275_vm7, %v1227_v10 }
 0x16e   : > { %958 = vmatprep.mubr.f32.mxu0 %v3479_v8  ;;  %1730 = vmatprep.mubr.f32.mxu1 %v3479_v8 }
 0x170   : > { %v1228_v49 = vpop.trf.xlu1  ;;  %v456_v1 = vpop.trf.xlu0 }
 0x171   : > { %2893 = vmatmul.mubr.msk.f32.gmra.mrb[66].mxu0 %vm503_vm6, %v456_v1  ;;  %2957 = vmatmul.mubr.msk.f32.gmra.mrb[66].mxu1 %vm1275_vm7, %v1228_v49 }
 0x172   : > { %964 = vmatprep.mubr.f32.mxu0 %v3479_v8  ;;  %1736 = vmatprep.mubr.f32.mxu1 %v3479_v8 }
 0x174   : > { %v1229_v17 = vpop.trf.xlu1  ;;  %v457_v12 = vpop.trf.xlu0 }
 0x175   : > { %2894 = vmatmul.mubr.msk.f32.gmra.mrb[68].mxu0 %vm503_vm6, %v457_v12  ;;  %2958 = vmatmul.mubr.msk.f32.gmra.mrb[68].mxu1 %vm1275_vm7, %v1229_v17 }
 0x176   : > { %970 = vmatprep.mubr.f32.mxu0 %v3479_v8  ;;  %1742 = vmatprep.mubr.f32.mxu1 %v3479_v8 }
 0x178   : > { %v1230_v13 = vpop.trf.xlu1  ;;  %v458_v14 = vpop.trf.xlu0 }
 0x179   : > { %2895 = vmatmul.mubr.msk.f32.gmra.mrb[70].mxu0 %vm503_vm6, %v458_v14  ;;  %2959 = vmatmul.mubr.msk.f32.gmra.mrb[70].mxu1 %vm1275_vm7, %v1230_v13 }
 0x17a   : > { %976 = vmatprep.mubr.f32.mxu0 %v3479_v8  ;;  %1748 = vmatprep.mubr.f32.mxu1 %v3479_v8 }
 0x17c   : > { %v1231_v15 = vpop.trf.xlu1  ;;  %v459_v19 = vpop.trf.xlu0 }
 0x17d   : > { %2896 = vmatmul.mubr.msk.f32.gmra.mrb[72].mxu0 %vm503_vm6, %v459_v19  ;;  %2960 = vmatmul.mubr.msk.f32.gmra.mrb[72].mxu1 %vm1275_vm7, %v1231_v15 }
 0x17e   : > { %982 = vmatprep.mubr.f32.mxu0 %v3479_v8  ;;  %1754 = vmatprep.mubr.f32.mxu1 %v3479_v8 }
 0x180   : > { %v1232_v20 = vpop.trf.xlu1  ;;  %v460_v21 = vpop.trf.xlu0 }
 0x181   : > { %2897 = vmatmul.mubr.msk.f32.gmra.mrb[74].mxu0 %vm503_vm6, %v460_v21  ;;  %2961 = vmatmul.mubr.msk.f32.gmra.mrb[74].mxu1 %vm1275_vm7, %v1232_v20 }
 0x182   : > { %988 = vmatprep.mubr.f32.mxu0 %v3479_v8  ;;  %1760 = vmatprep.mubr.f32.mxu1 %v3479_v8 }
 0x184   : > { %v1233_v22 = vpop.trf.xlu1  ;;  %v461_v23 = vpop.trf.xlu0 }
 0x185   : > { %2898 = vmatmul.mubr.msk.f32.gmra.mrb[76].mxu0 %vm503_vm6, %v461_v23  ;;  %2962 = vmatmul.mubr.msk.f32.gmra.mrb[76].mxu1 %vm1275_vm7, %v1233_v22 }
 0x186   : > { %994 = vmatprep.mubr.f32.mxu0 %v3479_v8  ;;  %1766 = vmatprep.mubr.f32.mxu1 %v3479_v8 }
 0x188   : > { %v1234_v25 = vpop.trf.xlu1  ;;  %v462_v26 = vpop.trf.xlu0 }
 0x189   : > { %2899 = vmatmul.mubr.msk.f32.gmra.mrb[78].mxu0 %vm503_vm6, %v462_v26  ;;  %2963 = vmatmul.mubr.msk.f32.gmra.mrb[78].mxu1 %vm1275_vm7, %v1234_v25 }
 0x18a   : > { %1000 = vmatprep.mubr.f32.mxu0 %v3479_v8  ;;  %1772 = vmatprep.mubr.f32.mxu1 %v3479_v8 }
 0x18c   : > { %v1235_v27 = vpop.trf.xlu1  ;;  %v463_v16 = vpop.trf.xlu0 }
 0x18d   : > { %2900 = vmatmul.mubr.msk.f32.gmra.mrb[80].mxu0 %vm503_vm6, %v463_v16  ;;  %2964 = vmatmul.mubr.msk.f32.gmra.mrb[80].mxu1 %vm1275_vm7, %v1235_v27 }
 0x18e   : > { %1006 = vmatprep.mubr.f32.mxu0 %v3479_v8  ;;  %1778 = vmatprep.mubr.f32.mxu1 %v3479_v8 }
 0x190   : > { %v1236_v28 = vpop.trf.xlu1  ;;  %v464_v30 = vpop.trf.xlu0 }
 0x191   : > { %2901 = vmatmul.mubr.msk.f32.gmra.mrb[82].mxu0 %vm503_vm6, %v464_v30  ;;  %2965 = vmatmul.mubr.msk.f32.gmra.mrb[82].mxu1 %vm1275_vm7, %v1236_v28 }
 0x192   : > { %1012 = vmatprep.mubr.f32.mxu0 %v3479_v8  ;;  %1784 = vmatprep.mubr.f32.mxu1 %v3479_v8 }
 0x194   : > { %v1237_v31 = vpop.trf.xlu1  ;;  %v465_v33 = vpop.trf.xlu0 }
 0x195   : > { %2902 = vmatmul.mubr.msk.f32.gmra.mrb[84].mxu0 %vm503_vm6, %v465_v33  ;;  %2966 = vmatmul.mubr.msk.f32.gmra.mrb[84].mxu1 %vm1275_vm7, %v1237_v31 }
 0x196   : > { %1018 = vmatprep.mubr.f32.mxu0 %v3479_v8  ;;  %1790 = vmatprep.mubr.f32.mxu1 %v3479_v8 }
 0x198   : > { %v1238_v34 = vpop.trf.xlu1  ;;  %v466_v35 = vpop.trf.xlu0 }
 0x199   : > { %2903 = vmatmul.mubr.msk.f32.gmra.mrb[86].mxu0 %vm503_vm6, %v466_v35  ;;  %2967 = vmatmul.mubr.msk.f32.gmra.mrb[86].mxu1 %vm1275_vm7, %v1238_v34 }
 0x19a   : > { %1024 = vmatprep.mubr.f32.mxu0 %v3479_v8  ;;  %1796 = vmatprep.mubr.f32.mxu1 %v3479_v8 }
 0x19c   : > { %v1239_v37 = vpop.trf.xlu1  ;;  %v467_v38 = vpop.trf.xlu0 }
 0x19d   : > { %2904 = vmatmul.mubr.msk.f32.gmra.mrb[88].mxu0 %vm503_vm6, %v467_v38  ;;  %2968 = vmatmul.mubr.msk.f32.gmra.mrb[88].mxu1 %vm1275_vm7, %v1239_v37 }
 0x19e   : > { %1030 = vmatprep.mubr.f32.mxu0 %v3479_v8  ;;  %1802 = vmatprep.mubr.f32.mxu1 %v3479_v8 }
 0x1a0   : > { %v1240_v39 = vpop.trf.xlu1  ;;  %v468_v40 = vpop.trf.xlu0 }
 0x1a1   : > { %2905 = vmatmul.mubr.msk.f32.gmra.mrb[90].mxu0 %vm503_vm6, %v468_v40  ;;  %2969 = vmatmul.mubr.msk.f32.gmra.mrb[90].mxu1 %vm1275_vm7, %v1240_v39 }
 0x1a2   : > { %1036 = vmatprep.mubr.f32.mxu0 %v3479_v8  ;;  %1808 = vmatprep.mubr.f32.mxu1 %v3479_v8 }
 0x1a4   : > { %v1241_v41 = vpop.trf.xlu1  ;;  %v469_v56 = vpop.trf.xlu0 }
 0x1a5   : > { %2906 = vmatmul.mubr.msk.f32.gmra.mrb[92].mxu0 %vm503_vm6, %v469_v56  ;;  %2970 = vmatmul.mubr.msk.f32.gmra.mrb[92].mxu1 %vm1275_vm7, %v1241_v41 }
 0x1a6   : > { %1042 = vmatprep.mubr.f32.mxu0 %v3479_v8  ;;  %1814 = vmatprep.mubr.f32.mxu1 %v3479_v8 }
 0x1a8   : > { %v1242_v42 = vpop.trf.xlu1  ;;  %v470_v44 = vpop.trf.xlu0 }
 0x1a9   : > { %2907 = vmatmul.mubr.msk.f32.gmra.mrb[94].mxu0 %vm503_vm6, %v470_v44  ;;  %2971 = vmatmul.mubr.msk.f32.gmra.mrb[94].mxu1 %vm1275_vm7, %v1242_v42 }
 0x1aa   : > { %1048 = vmatprep.mubr.f32.mxu0 %v3479_v8  ;;  %1820 = vmatprep.mubr.f32.mxu1 %v3479_v8 }
 0x1ac   : > { %v487_v45 = vpop.trf.xlu1  ;;  %v1259_v48 = vpop.trf.xlu0 }
 0x1ad   : > { %2908 = vmatmul.mubr.msk.f32.gmra.mrb[96].mxu0 %vm503_vm6, %v487_v45  ;;  %2972 = vmatmul.mubr.msk.f32.gmra.mrb[96].mxu1 %vm1275_vm7, %v1259_v48 }
 0x1ae   : > { %1054 = vmatprep.mubr.f32.mxu0 %v3479_v8  ;;  %1826 = vmatprep.mubr.f32.mxu1 %v3479_v8 }
 0x1b0   : > { %v488_v50 = vpop.trf.xlu1  ;;  %v1260_v51 = vpop.trf.xlu0 }
 0x1b1   : > { %2909 = vmatmul.mubr.msk.f32.gmra.mrb[98].mxu0 %vm503_vm6, %v488_v50  ;;  %2973 = vmatmul.mubr.msk.f32.gmra.mrb[98].mxu1 %vm1275_vm7, %v1260_v51 }
 0x1b2   : > { %1060 = vmatprep.mubr.f32.mxu0 %v3479_v8  ;;  %1832 = vmatprep.mubr.f32.mxu1 %v3479_v8 }
 0x1b4   : > { %v489_v52 = vpop.trf.xlu1  ;;  %v1261_v53 = vpop.trf.xlu0 }
 0x1b5   : > { %2910 = vmatmul.mubr.msk.f32.gmra.mrb[100].mxu0 %vm503_vm6, %v489_v52  ;;  %2974 = vmatmul.mubr.msk.f32.gmra.mrb[100].mxu1 %vm1275_vm7, %v1261_v53 }
 0x1b6   : > { %1066 = vmatprep.mubr.f32.mxu0 %v3479_v8  ;;  %1838 = vmatprep.mubr.f32.mxu1 %v3479_v8 }
 0x1b8   : > { %v490_v54 = vpop.trf.xlu1  ;;  %v1262_v59 = vpop.trf.xlu0 }
 0x1b9   : > { %2911 = vmatmul.mubr.msk.f32.gmra.mrb[102].mxu0 %vm503_vm6, %v490_v54  ;;  %2975 = vmatmul.mubr.msk.f32.gmra.mrb[102].mxu1 %vm1275_vm7, %v1262_v59 }
 0x1ba   : > { %1072 = vmatprep.mubr.f32.mxu0 %v3479_v8  ;;  %1844 = vmatprep.mubr.f32.mxu1 %v3479_v8 }
 0x1bc   : > { %v491_v61 = vpop.trf.xlu1  ;;  %v1263_v63 = vpop.trf.xlu0 }
 0x1bd   : > { %2912 = vmatmul.mubr.msk.f32.gmra.mrb[104].mxu0 %vm503_vm6, %v491_v61  ;;  %2976 = vmatmul.mubr.msk.f32.gmra.mrb[104].mxu1 %vm1275_vm7, %v1263_v63 }
 0x1be   : > { %1078 = vmatprep.mubr.f32.mxu0 %v3479_v8  ;;  %1850 = vmatprep.mubr.f32.mxu1 %v3479_v8 }
 0x1c0   : > { %v762_v0 = vpop.f32.mrb[0].mxu0  ;;  %v1534_v2 = vpop.f32.mrb[0].mxu1 }
 0x1c1   : > { %v1917_v3 = vmul.f32 %v1534_v2, %v762_v0  ;;  %v764_v4 = vpop.f32.mrb[1].mxu0  ;;  %v1536_v5 = vpop.f32.mrb[1].mxu1 }
 0x1c2   : > { %v1981_v6 = vmul.f32 %v1536_v5, %v764_v4  ;;  %v492_v7 = vpop.trf.xlu1  ;;  %v1264_v10 = vpop.trf.xlu0 }
 0x1c3   : > { %2913 = vmatmul.mubr.msk.f32.gmra.mrb[106].mxu0 %vm503_vm6, %v492_v7  ;;  %2977 = vmatmul.mubr.msk.f32.gmra.mrb[106].mxu1 %vm1275_vm7, %v1264_v10 }
 0x1c4   : > { %v2045_v11 = vadd.f32 %v1981_v6, %v1917_v3  ;;  %v768_v49 = vpop.f32.mrb[2].mxu0  ;;  %v1540_v1 = vpop.f32.mrb[2].mxu1  ;;  %1084 = vmatprep.mubr.f32.mxu0 %v3479_v8  ;;  %1856 = vmatprep.mubr.f32.mxu1 %v3479_v8 }
 0x1c5   : > { %v1918_v17 = vmul.f32 %v1540_v1, %v768_v49  ;;  %v770_v12 = vpop.f32.mrb[3].mxu0  ;;  %v1542_v13 = vpop.f32.mrb[3].mxu1 }
 0x1c6   : > { %v1982_v14 = vmul.f32 %v1542_v13, %v770_v12  ;;  %v493_v15 = vpop.trf.xlu1  ;;  %v1265_v19 = vpop.trf.xlu0 }
 0x1c7   : > { %2914 = vmatmul.mubr.msk.f32.gmra.mrb[108].mxu0 %vm503_vm6, %v493_v15  ;;  %2978 = vmatmul.mubr.msk.f32.gmra.mrb[108].mxu1 %vm1275_vm7, %v1265_v19 }
 0x1c8   : > { %v2046_v20 = vadd.f32 %v1982_v14, %v1918_v17  ;;  %v774_v21 = vpop.f32.mrb[4].mxu0  ;;  %v1546_v22 = vpop.f32.mrb[4].mxu1  ;;  %1090 = vmatprep.mubr.f32.mxu0 %v3479_v8  ;;  %1862 = vmatprep.mubr.f32.mxu1 %v3479_v8 }
 0x1c9   : > { %v1919_v23 = vmul.f32 %v1546_v22, %v774_v21  ;;  %v776_v25 = vpop.f32.mrb[5].mxu0  ;;  %v1548_v26 = vpop.f32.mrb[5].mxu1 }
 0x1ca   : > { %v3149_v27 = vpack.c.bf16 %v2046_v20, %v2045_v11  ;;  %v1983_v16 = vmul.f32 %v1548_v26, %v776_v25  ;;  %v494_v28 = vpop.trf.xlu1  ;;  %v1266_v30 = vpop.trf.xlu0 }
 0x1cb   : > { %2915 = vmatmul.mubr.msk.f32.gmra.mrb[110].mxu0 %vm503_vm6, %v494_v28  ;;  %2979 = vmatmul.mubr.msk.f32.gmra.mrb[110].mxu1 %vm1275_vm7, %v1266_v30 }
 0x1cc   : > { %v2047_v31 = vadd.f32 %v1983_v16, %v1919_v23  ;;  %v780_v33 = vpop.f32.mrb[6].mxu0  ;;  %v1552_v34 = vpop.f32.mrb[6].mxu1  ;;  %3150 = vmatpush1.bf16.msra.mxu1 %v3149_v27  ;;  %1096 = vmatprep.mubr.f32.mxu0 %v3479_v8 }
 0x1cd   : > { %v1920_v35 = vmul.f32 %v1552_v34, %v780_v33  ;;  %v782_v37 = vpop.f32.mrb[7].mxu0  ;;  %v1554_v38 = vpop.f32.mrb[7].mxu1  ;;  %3151 = vmatprep.subr.bf16.mxu1 %v3480_v47  ;;  %1868 = vmatprep.mubr.f32.mxu1 %v3479_v8  ;;  %v3330_v33 = vld [vmem:[%s3590_s25] sm:$0x77] }
 0x1ce   : > { %v1984_v39 = vmul.f32 %v1554_v38, %v782_v37  ;;  %v495_v40 = vpop.trf.xlu1  ;;  %v1267_v41 = vpop.trf.xlu0  ;;  %v2125_v34 = vrot.slane %v3330_v33, %v2124_v46 }
 0x1cf   : > { %2916 = vmatmul.mubr.msk.f32.gmra.mrb[112].mxu0 %vm503_vm6, %v495_v40  ;;  %2980 = vmatmul.mubr.msk.f32.gmra.mrb[112].mxu1 %vm1275_vm7, %v1267_v41 }
 0x1d0   : > { %v2048_v56 = vadd.f32 %v1984_v39, %v1920_v35  ;;  %v786_v42 = vpop.f32.mrb[8].mxu0  ;;  %v1558_v44 = vpop.f32.mrb[8].mxu1  ;;  %1102 = vmatprep.mubr.f32.mxu0 %v3479_v8  ;;  %1874 = vmatprep.mubr.f32.mxu1 %v3479_v8 }
 0x1d1   : > { %v1921_v45 = vmul.f32 %v1558_v44, %v786_v42  ;;  %v788_v48 = vpop.f32.mrb[9].mxu0  ;;  %v1560_v50 = vpop.f32.mrb[9].mxu1 }
 0x1d2   : > { %v3152_v51 = vpack.c.bf16 %v2048_v56, %v2047_v31  ;;  %v1985_v52 = vmul.f32 %v1560_v50, %v788_v48  ;;  %v496_v53 = vpop.trf.xlu1  ;;  %v1268_v54 = vpop.trf.xlu0  ;;  %v4042_v48 = vrot.slane %v2125_v34, %v3635_v18 }
 0x1d3   : > { %2917 = vmatmul.mubr.msk.f32.gmra.mrb[114].mxu0 %vm503_vm6, %v496_v53  ;;  %2981 = vmatmul.mubr.msk.f32.gmra.mrb[114].mxu1 %vm1275_vm7, %v1268_v54 }
 0x1d4   : > { %v2049_v59 = vadd.f32 %v1985_v52, %v1921_v45  ;;  %v792_v61 = vpop.f32.mrb[10].mxu0  ;;  %v1564_v63 = vpop.f32.mrb[10].mxu1  ;;  %3153 = vmatpush1.bf16.msra.mxu1 %v3152_v51  ;;  %1880 = vmatprep.mubr.f32.mxu1 %v3479_v8  ;;  %vm2151_vm8 = vcmp.eq.s32.totalorder %v3623_v9, %v4042_v48  ;;  %vm2159_vm11 = vcmp.eq.s32.totalorder %v3655_v32, %v4042_v48 }
 0x1d5   : > { %v1922_v0 = vmul.f32 %v1564_v63, %v792_v61  ;;  %v794_v2 = vpop.f32.mrb[11].mxu0  ;;  %v1566_v3 = vpop.f32.mrb[11].mxu1  ;;  %3154 = vmatprep.subr.bf16.mxu1 %v3480_v47  ;;  %1108 = vmatprep.mubr.f32.mxu0 %v3479_v8  ;;  %vm2163_vm13 = vcmp.eq.s32.totalorder %v3662_v36, %v4042_v48  ;;  %vm2167_vm15 = vcmp.eq.s32.totalorder %v3668_v43, %v4042_v48 }
 0x1d6   : > { %v1986_v4 = vmul.f32 %v1566_v3, %v794_v2  ;;  %v1269_v5 = vpop.trf.xlu0  ;;  %v497_v6 = vpop.trf.xlu1  ;;  %vm2171_vm1 = vcmp.eq.s32.totalorder %v3683_v55, %v4042_v48  ;;  %vm2175_vm3 = vcmp.eq.s32.totalorder %v3697_v60, %v4042_v48  ;;  %vm2179_vm5 = vcmp.eq.s32.totalorder %v3702_v62, %v4042_v48 }
 0x1d7   : > { %2982 = vmatmul.mubr.msk.f32.gmra.mrb[116].mxu1 %vm1275_vm7, %v1269_v5  ;;  %2918 = vmatmul.mubr.msk.f32.gmra.mrb[116].mxu0 %vm503_vm6, %v497_v6 }
 0x1d8   : > { %v2050_v7 = vadd.f32 %v1986_v4, %v1922_v0  ;;  %v798_v10 = vpop.f32.mrb[12].mxu0  ;;  %v1570_v11 = vpop.f32.mrb[12].mxu1  ;;  %1886 = vmatprep.mubr.f32.mxu1 %v3479_v8  ;;  %1114 = vmatprep.mubr.f32.mxu0 %v3479_v8 }
 0x1d9   : > { %v1923_v49 = vmul.f32 %v1570_v11, %v798_v10  ;;  %v800_v1 = vpop.f32.mrb[13].mxu0  ;;  %v1572_v17 = vpop.f32.mrb[13].mxu1 }
 0x1da   : > { %v3155_v12 = vpack.c.bf16 %v2050_v7, %v2049_v59  ;;  %v1987_v13 = vmul.f32 %v1572_v17, %v800_v1  ;;  %v1270_v14 = vpop.trf.xlu0  ;;  %v498_v15 = vpop.trf.xlu1 }
 0x1db   : > { %2983 = vmatmul.mubr.msk.f32.gmra.mrb[118].mxu1 %vm1275_vm7, %v1270_v14  ;;  %2919 = vmatmul.mubr.msk.f32.gmra.mrb[118].mxu0 %vm503_vm6, %v498_v15 }
 0x1dc   : > { %v2051_v19 = vadd.f32 %v1987_v13, %v1923_v49  ;;  %v804_v20 = vpop.f32.mrb[14].mxu0  ;;  %v1576_v21 = vpop.f32.mrb[14].mxu1  ;;  %3156 = vmatpush1.bf16.msra.mxu1 %v3155_v12  ;;  %1892 = vmatprep.mubr.f32.mxu1 %v3479_v8  ;;  %v3481_v49 = vmov 1.0  }
 0x1dd   : > { %v1924_v22 = vmul.f32 %v1576_v21, %v804_v20  ;;  %v806_v23 = vpop.f32.mrb[15].mxu0  ;;  %v1578_v25 = vpop.f32.mrb[15].mxu1  ;;  %3157 = vmatprep.subr.bf16.mxu1 %v3480_v47  ;;  %1120 = vmatprep.mubr.f32.mxu0 %v3479_v8 }
 0x1de   : > { %v1988_v26 = vmul.f32 %v1578_v25, %v806_v23  ;;  %v1271_v27 = vpop.trf.xlu0  ;;  %v499_v16 = vpop.trf.xlu1 }
 0x1df   : > { %2984 = vmatmul.mubr.msk.f32.gmra.mrb[120].mxu1 %vm1275_vm7, %v1271_v27  ;;  %2920 = vmatmul.mubr.msk.f32.gmra.mrb[120].mxu0 %vm503_vm6, %v499_v16 }
 0x1e0   : > { %v2052_v28 = vadd.f32 %v1988_v26, %v1924_v22  ;;  %v810_v30 = vpop.f32.mrb[16].mxu0  ;;  %v1582_v31 = vpop.f32.mrb[16].mxu1  ;;  %1898 = vmatprep.mubr.f32.mxu1 %v3479_v8  ;;  %1126 = vmatprep.mubr.f32.mxu0 %v3479_v8 }
 0x1e1   : > { %v1925_v35 = vmul.f32 %v1582_v31, %v810_v30  ;;  %v812_v37 = vpop.f32.mrb[17].mxu0  ;;  %v1584_v38 = vpop.f32.mrb[17].mxu1 }
 0x1e2   : > { %v3158_v39 = vpack.c.bf16 %v2052_v28, %v2051_v19  ;;  %v1989_v40 = vmul.f32 %v1584_v38, %v812_v37  ;;  %v1272_v41 = vpop.trf.xlu0  ;;  %v500_v56 = vpop.trf.xlu1 }
 0x1e3   : > { %2985 = vmatmul.mubr.msk.f32.gmra.mrb[122].mxu1 %vm1275_vm7, %v1272_v41  ;;  %2921 = vmatmul.mubr.msk.f32.gmra.mrb[122].mxu0 %vm503_vm6, %v500_v56 }
 0x1e4   : > { %v2053_v42 = vadd.f32 %v1989_v40, %v1925_v35  ;;  %v816_v44 = vpop.f32.mrb[18].mxu0  ;;  %v1588_v45 = vpop.f32.mrb[18].mxu1  ;;  %3159 = vmatpush1.bf16.msra.mxu1 %v3158_v39  ;;  %1904 = vmatprep.mubr.f32.mxu1 %v3479_v8 }
 0x1e5   : > { %v1926_v46 = vmul.f32 %v1588_v45, %v816_v44  ;;  %v818_v50 = vpop.f32.mrb[19].mxu0  ;;  %v1590_v51 = vpop.f32.mrb[19].mxu1  ;;  %3160 = vmatprep.subr.bf16.mxu1 %v3480_v47  ;;  %1132 = vmatprep.mubr.f32.mxu0 %v3479_v8 }
 0x1e6   : > { %v1990_v52 = vmul.f32 %v1590_v51, %v818_v50  ;;  %v1273_v53 = vpop.trf.xlu0  ;;  %v501_v54 = vpop.trf.xlu1 }
 0x1e7   : > { %2986 = vmatmul.mubr.msk.f32.gmra.mrb[124].mxu1 %vm1275_vm7, %v1273_v53  ;;  %2922 = vmatmul.mubr.msk.f32.gmra.mrb[124].mxu0 %vm503_vm6, %v501_v54 }
 0x1e8   : > { %v2054_v59 = vadd.f32 %v1990_v52, %v1926_v46  ;;  %v822_v61 = vpop.f32.mrb[20].mxu0  ;;  %v1594_v63 = vpop.f32.mrb[20].mxu1  ;;  %1910 = vmatprep.mubr.f32.mxu1 %v3479_v8  ;;  %1138 = vmatprep.mubr.f32.mxu0 %v3479_v8 }
 0x1e9   : > { %v1927_v18 = vmul.f32 %v1594_v63, %v822_v61  ;;  %v824_v0 = vpop.f32.mrb[21].mxu0  ;;  %v1596_v2 = vpop.f32.mrb[21].mxu1 }
 0x1ea   : > { %v3161_v3 = vpack.c.bf16 %v2054_v59, %v2053_v42  ;;  %v1991_v4 = vmul.f32 %v1596_v2, %v824_v0  ;;  %v1274_v5 = vpop.trf.xlu0  ;;  %v502_v6 = vpop.trf.xlu1 }
 0x1eb   : > { %2987 = vmatmul.mubr.msk.f32.gmra.mrb[126].mxu1 %vm1275_vm7, %v1274_v5  ;;  %2923 = vmatmul.mubr.msk.f32.gmra.mrb[126].mxu0 %vm503_vm6, %v502_v6  ;;  %vm2150_vm6 = vcmp.eq.s32.totalorder %v3623_v9, %v3648_v29  ;;  %vm2155_vm7 = vcmp.eq.s32.totalorder %v3644_v24, %v4042_v48 }
 0x1ec   : > { %v2055_v7 = vadd.f32 %v1991_v4, %v1927_v18  ;;  %v828_v10 = vpop.f32.mrb[22].mxu0  ;;  %v1600_v11 = vpop.f32.mrb[22].mxu1  ;;  %3162 = vmatpush1.bf16.msra.mxu1 %v3161_v3  ;;  %3056 = vmatprep.mubr.msk.f32.mxu1 %vm2151_vm8, %v3481_v49  ;;  %vm2178_vm8 = vcmp.eq.s32.totalorder %v3702_v62, %v3648_v29 }
 0x1ed   : > { %v1928_v8 = vmul.f32 %v1600_v11, %v828_v10  ;;  %v830_v1 = vpop.f32.mrb[23].mxu0  ;;  %v1602_v17 = vpop.f32.mrb[23].mxu1  ;;  %3163 = vmatprep.subr.bf16.mxu1 %v3480_v47  ;;  %3090 = vmatprep.mubr.msk.f32.mxu0 %vm2153_vm9, %v3481_v49 }
 0x1ee   : > { %v1992_v12 = vmul.f32 %v1602_v17, %v830_v1 }
 0x1f0   : > { %v2056_v13 = vadd.f32 %v1992_v12, %v1928_v8  ;;  %v834_v14 = vpop.f32.mrb[24].mxu0  ;;  %v1606_v15 = vpop.f32.mrb[24].mxu1 }
 0x1f1   : > { %v1929_v19 = vmul.f32 %v1606_v15, %v834_v14  ;;  %v836_v20 = vpop.f32.mrb[25].mxu0  ;;  %v1608_v21 = vpop.f32.mrb[25].mxu1 }
 0x1f2   : > { %v3164_v22 = vpack.c.bf16 %v2056_v13, %v2055_v7  ;;  %v1993_v23 = vmul.f32 %v1608_v21, %v836_v20 }
 0x1f4   : > { %v2057_v25 = vadd.f32 %v1993_v23, %v1929_v19  ;;  %v840_v26 = vpop.f32.mrb[26].mxu0  ;;  %v1612_v27 = vpop.f32.mrb[26].mxu1  ;;  %3165 = vmatpush1.bf16.msra.mxu1 %v3164_v22 }
 0x1f5   : > { %v1930_v16 = vmul.f32 %v1612_v27, %v840_v26  ;;  %v842_v28 = vpop.f32.mrb[27].mxu0  ;;  %v1614_v30 = vpop.f32.mrb[27].mxu1  ;;  %3166 = vmatprep.subr.bf16.mxu1 %v3480_v47 }
 0x1f6   : > { %v1994_v31 = vmul.f32 %v1614_v30, %v842_v28 }
 0x1f8   : > { %v2058_v33 = vadd.f32 %v1994_v31, %v1930_v16  ;;  %v846_v34 = vpop.f32.mrb[28].mxu0  ;;  %v1618_v35 = vpop.f32.mrb[28].mxu1 }
 0x1f9   : > { %v1931_v37 = vmul.f32 %v1618_v35, %v846_v34  ;;  %v848_v38 = vpop.f32.mrb[29].mxu0  ;;  %v1620_v39 = vpop.f32.mrb[29].mxu1 }
 0x1fa   : > { %v3167_v40 = vpack.c.bf16 %v2058_v33, %v2057_v25  ;;  %v1995_v41 = vmul.f32 %v1620_v39, %v848_v38 }
 0x1fc   : > { %v2059_v56 = vadd.f32 %v1995_v41, %v1931_v37  ;;  %v852_v42 = vpop.f32.mrb[30].mxu0  ;;  %v1624_v44 = vpop.f32.mrb[30].mxu1  ;;  %3168 = vmatpush1.bf16.msra.mxu1 %v3167_v40 }
 0x1fd   : > { %v1932_v45 = vmul.f32 %v1624_v44, %v852_v42  ;;  %v854_v46 = vpop.f32.mrb[31].mxu0  ;;  %v1626_v50 = vpop.f32.mrb[31].mxu1  ;;  %3169 = vmatprep.subr.bf16.mxu1 %v3480_v47 }
 0x1fe   : > { %v1996_v51 = vmul.f32 %v1626_v50, %v854_v46 }
 0x200   : > { %v2060_v52 = vadd.f32 %v1996_v51, %v1932_v45  ;;  %v858_v53 = vpop.f32.mrb[32].mxu0  ;;  %v1630_v54 = vpop.f32.mrb[32].mxu1 }
 0x201   : > { %v1933_v59 = vmul.f32 %v1630_v54, %v858_v53  ;;  %v860_v61 = vpop.f32.mrb[33].mxu0  ;;  %v1632_v63 = vpop.f32.mrb[33].mxu1 }
 0x202   : > { %v3170_v18 = vpack.c.bf16 %v2060_v52, %v2059_v56  ;;  %v1997_v0 = vmul.f32 %v1632_v63, %v860_v61 }
 0x204   : > { %v2061_v2 = vadd.f32 %v1997_v0, %v1933_v59  ;;  %v864_v3 = vpop.f32.mrb[34].mxu0  ;;  %v1636_v4 = vpop.f32.mrb[34].mxu1  ;;  %3171 = vmatpush1.bf16.msra.mxu1 %v3170_v18 }
 0x205   : > { %v1934_v5 = vmul.f32 %v1636_v4, %v864_v3  ;;  %v866_v6 = vpop.f32.mrb[35].mxu0  ;;  %v1638_v7 = vpop.f32.mrb[35].mxu1  ;;  %3172 = vmatprep.subr.bf16.mxu1 %v3480_v47 }
 0x206   : > { %v1998_v10 = vmul.f32 %v1638_v7, %v866_v6 }
 0x208   : > { %v2062_v11 = vadd.f32 %v1998_v10, %v1934_v5  ;;  %v870_v8 = vpop.f32.mrb[36].mxu0  ;;  %v1642_v1 = vpop.f32.mrb[36].mxu1 }
 0x209   : > { %v1935_v17 = vmul.f32 %v1642_v1, %v870_v8  ;;  %v872_v12 = vpop.f32.mrb[37].mxu0  ;;  %v1644_v13 = vpop.f32.mrb[37].mxu1 }
 0x20a   : > { %v3173_v14 = vpack.c.bf16 %v2062_v11, %v2061_v2  ;;  %v1999_v15 = vmul.f32 %v1644_v13, %v872_v12 }
 0x20c   : > { %v2063_v19 = vadd.f32 %v1999_v15, %v1935_v17  ;;  %v876_v20 = vpop.f32.mrb[38].mxu0  ;;  %v1648_v21 = vpop.f32.mrb[38].mxu1  ;;  %3174 = vmatpush1.bf16.msra.mxu1 %v3173_v14 }
 0x20d   : > { %v1936_v22 = vmul.f32 %v1648_v21, %v876_v20  ;;  %v878_v23 = vpop.f32.mrb[39].mxu0  ;;  %v1650_v25 = vpop.f32.mrb[39].mxu1  ;;  %3175 = vmatprep.subr.bf16.mxu1 %v3480_v47 }
 0x20e   : > { %v2000_v26 = vmul.f32 %v1650_v25, %v878_v23 }
 0x210   : > { %v2064_v27 = vadd.f32 %v2000_v26, %v1936_v22  ;;  %v882_v16 = vpop.f32.mrb[40].mxu0  ;;  %v1654_v28 = vpop.f32.mrb[40].mxu1 }
 0x211   : > { %v1937_v30 = vmul.f32 %v1654_v28, %v882_v16  ;;  %v884_v31 = vpop.f32.mrb[41].mxu0  ;;  %v1656_v33 = vpop.f32.mrb[41].mxu1 }
 0x212   : > { %v3176_v34 = vpack.c.bf16 %v2064_v27, %v2063_v19  ;;  %v2001_v35 = vmul.f32 %v1656_v33, %v884_v31 }
 0x214   : > { %v2065_v37 = vadd.f32 %v2001_v35, %v1937_v30  ;;  %v888_v38 = vpop.f32.mrb[42].mxu0  ;;  %v1660_v39 = vpop.f32.mrb[42].mxu1  ;;  %3177 = vmatpush1.bf16.msra.mxu1 %v3176_v34 }
 0x215   : > { %v1938_v40 = vmul.f32 %v1660_v39, %v888_v38  ;;  %v890_v41 = vpop.f32.mrb[43].mxu0  ;;  %v1662_v56 = vpop.f32.mrb[43].mxu1  ;;  %3178 = vmatprep.subr.bf16.mxu1 %v3480_v47 }
 0x216   : > { %v2002_v42 = vmul.f32 %v1662_v56, %v890_v41 }
 0x218   : > { %v2066_v44 = vadd.f32 %v2002_v42, %v1938_v40  ;;  %v894_v45 = vpop.f32.mrb[44].mxu0  ;;  %v1666_v46 = vpop.f32.mrb[44].mxu1 }
 0x219   : > { %v1939_v50 = vmul.f32 %v1666_v46, %v894_v45  ;;  %v896_v51 = vpop.f32.mrb[45].mxu0  ;;  %v1668_v52 = vpop.f32.mrb[45].mxu1 }
 0x21a   : > { %v3179_v53 = vpack.c.bf16 %v2066_v44, %v2065_v37  ;;  %v2003_v54 = vmul.f32 %v1668_v52, %v896_v51 }
 0x21c   : > { %v2067_v59 = vadd.f32 %v2003_v54, %v1939_v50  ;;  %v900_v61 = vpop.f32.mrb[46].mxu0  ;;  %v1672_v63 = vpop.f32.mrb[46].mxu1  ;;  %3180 = vmatpush1.bf16.msra.mxu1 %v3179_v53 }
 0x21d   : > { %v1940_v18 = vmul.f32 %v1672_v63, %v900_v61  ;;  %v902_v0 = vpop.f32.mrb[47].mxu0  ;;  %v1674_v2 = vpop.f32.mrb[47].mxu1  ;;  %3181 = vmatprep.subr.bf16.mxu1 %v3480_v47 }
 0x21e   : > { %v2004_v3 = vmul.f32 %v1674_v2, %v902_v0 }
 0x220   : > { %v2068_v4 = vadd.f32 %v2004_v3, %v1940_v18  ;;  %v906_v5 = vpop.f32.mrb[48].mxu0  ;;  %v1678_v6 = vpop.f32.mrb[48].mxu1 }
 0x221   : > { %v1941_v7 = vmul.f32 %v1678_v6, %v906_v5  ;;  %v908_v10 = vpop.f32.mrb[49].mxu0  ;;  %v1680_v11 = vpop.f32.mrb[49].mxu1 }
 0x222   : > { %v3182_v8 = vpack.c.bf16 %v2068_v4, %v2067_v59  ;;  %v2005_v1 = vmul.f32 %v1680_v11, %v908_v10 }
 0x224   : > { %v2069_v17 = vadd.f32 %v2005_v1, %v1941_v7  ;;  %v912_v12 = vpop.f32.mrb[50].mxu0  ;;  %v1684_v13 = vpop.f32.mrb[50].mxu1  ;;  %3183 = vmatpush1.bf16.msra.mxu1 %v3182_v8 }
 0x225   : > { %v1942_v14 = vmul.f32 %v1684_v13, %v912_v12  ;;  %v914_v15 = vpop.f32.mrb[51].mxu0  ;;  %v1686_v19 = vpop.f32.mrb[51].mxu1  ;;  %3184 = vmatprep.subr.bf16.mxu1 %v3480_v47 }
 0x226   : > { %v2006_v20 = vmul.f32 %v1686_v19, %v914_v15 }
 0x228   : > { %v2070_v21 = vadd.f32 %v2006_v20, %v1942_v14  ;;  %v918_v22 = vpop.f32.mrb[52].mxu0  ;;  %v1690_v23 = vpop.f32.mrb[52].mxu1 }
 0x229   : > { %v1943_v25 = vmul.f32 %v1690_v23, %v918_v22  ;;  %v920_v26 = vpop.f32.mrb[53].mxu0  ;;  %v1692_v27 = vpop.f32.mrb[53].mxu1 }
 0x22a   : > { %v3185_v16 = vpack.c.bf16 %v2070_v21, %v2069_v17  ;;  %v2007_v28 = vmul.f32 %v1692_v27, %v920_v26 }
 0x22c   : > { %v2071_v30 = vadd.f32 %v2007_v28, %v1943_v25  ;;  %v924_v31 = vpop.f32.mrb[54].mxu0  ;;  %v1696_v33 = vpop.f32.mrb[54].mxu1  ;;  %3186 = vmatpush1.bf16.msra.mxu1 %v3185_v16 }
 0x22d   : > { %v1944_v34 = vmul.f32 %v1696_v33, %v924_v31  ;;  %v926_v35 = vpop.f32.mrb[55].mxu0  ;;  %v1698_v37 = vpop.f32.mrb[55].mxu1  ;;  %3187 = vmatprep.subr.bf16.mxu1 %v3480_v47 }
 0x22e   : > { %v2008_v38 = vmul.f32 %v1698_v37, %v926_v35 }
 0x230   : > { %v2072_v39 = vadd.f32 %v2008_v38, %v1944_v34  ;;  %v930_v40 = vpop.f32.mrb[56].mxu0  ;;  %v1702_v41 = vpop.f32.mrb[56].mxu1 }
 0x231   : > { %v1945_v56 = vmul.f32 %v1702_v41, %v930_v40  ;;  %v932_v42 = vpop.f32.mrb[57].mxu0  ;;  %v1704_v44 = vpop.f32.mrb[57].mxu1 }
 0x232   : > { %v3188_v45 = vpack.c.bf16 %v2072_v39, %v2071_v30  ;;  %v2009_v46 = vmul.f32 %v1704_v44, %v932_v42 }
 0x234   : > { %v2073_v50 = vadd.f32 %v2009_v46, %v1945_v56  ;;  %v936_v51 = vpop.f32.mrb[58].mxu0  ;;  %v1708_v52 = vpop.f32.mrb[58].mxu1  ;;  %3189 = vmatpush1.bf16.msra.mxu1 %v3188_v45 }
 0x235   : > { %v1946_v53 = vmul.f32 %v1708_v52, %v936_v51  ;;  %v938_v54 = vpop.f32.mrb[59].mxu0  ;;  %v1710_v59 = vpop.f32.mrb[59].mxu1  ;;  %3190 = vmatprep.subr.bf16.mxu1 %v3480_v47 }
 0x236   : > { %v2010_v61 = vmul.f32 %v1710_v59, %v938_v54 }
 0x238   : > { %v2074_v63 = vadd.f32 %v2010_v61, %v1946_v53  ;;  %v942_v18 = vpop.f32.mrb[60].mxu0  ;;  %v1714_v0 = vpop.f32.mrb[60].mxu1 }
 0x239   : > { %v1947_v2 = vmul.f32 %v1714_v0, %v942_v18  ;;  %v944_v3 = vpop.f32.mrb[61].mxu0  ;;  %v1716_v4 = vpop.f32.mrb[61].mxu1 }
 0x23a   : > { %v3191_v5 = vpack.c.bf16 %v2074_v63, %v2073_v50  ;;  %v2011_v6 = vmul.f32 %v1716_v4, %v944_v3 }
 0x23c   : > { %v2075_v7 = vadd.f32 %v2011_v6, %v1947_v2  ;;  %v948_v10 = vpop.f32.mrb[62].mxu0  ;;  %v1720_v11 = vpop.f32.mrb[62].mxu1  ;;  %3192 = vmatpush1.bf16.msra.mxu1 %v3191_v5 }
 0x23d   : > { %v1948_v8 = vmul.f32 %v1720_v11, %v948_v10  ;;  %v950_v1 = vpop.f32.mrb[63].mxu0  ;;  %v1722_v17 = vpop.f32.mrb[63].mxu1  ;;  %3193 = vmatprep.subr.bf16.mxu1 %v3480_v47 }
 0x23e   : > { %v2012_v12 = vmul.f32 %v1722_v17, %v950_v1 }
 0x240   : > { %v2076_v13 = vadd.f32 %v2012_v12, %v1948_v8  ;;  %v954_v14 = vpop.f32.mrb[64].mxu0  ;;  %v1726_v15 = vpop.f32.mrb[64].mxu1 }
 0x241   : > { %v1949_v19 = vmul.f32 %v1726_v15, %v954_v14  ;;  %v956_v20 = vpop.f32.mrb[65].mxu0  ;;  %v1728_v21 = vpop.f32.mrb[65].mxu1 }
 0x242   : > { %v3194_v22 = vpack.c.bf16 %v2076_v13, %v2075_v7  ;;  %v2013_v23 = vmul.f32 %v1728_v21, %v956_v20 }
 0x244   : > { %v2077_v25 = vadd.f32 %v2013_v23, %v1949_v19  ;;  %v960_v26 = vpop.f32.mrb[66].mxu0  ;;  %v1732_v27 = vpop.f32.mrb[66].mxu1  ;;  %3195 = vmatpush1.bf16.msra.mxu1 %v3194_v22 }
 0x245   : > { %v1950_v16 = vmul.f32 %v1732_v27, %v960_v26  ;;  %v962_v28 = vpop.f32.mrb[67].mxu0  ;;  %v1734_v30 = vpop.f32.mrb[67].mxu1  ;;  %3244 = vmatprep.subr.bf16.mxu1 %v3480_v47  ;;  %v4118_v27 = vadd.s32 64, %v3623_v9 }
 0x246   : > { %v2014_v31 = vmul.f32 %v1734_v30, %v962_v28 }
 0x247   : > { %3057 = vmatmul.mubr.msk.f32.vlgmr.msra.gmra.mrb[128].mxu1 %vm2150_vm6, %v3481_v49  ;;  %vm2183_vm6 = vcmp.eq.s32.totalorder %v4118_v27, %v4042_v48 }
 0x248   : > { %v2078_v33 = vadd.f32 %v2014_v31, %v1950_v16  ;;  %v966_v34 = vpop.f32.mrb[68].mxu0  ;;  %v1738_v35 = vpop.f32.mrb[68].mxu1  ;;  %3058 = vmatprep.mubr.msk.f32.mxu1 %vm2155_vm7, %v3481_v49  ;;  %vm2182_vm7 = vcmp.eq.s32.totalorder %v4118_v27, %v3648_v29 }
 0x249   : > { %v1951_v37 = vmul.f32 %v1738_v35, %v966_v34  ;;  %v968_v38 = vpop.f32.mrb[69].mxu0  ;;  %v1740_v39 = vpop.f32.mrb[69].mxu1  ;;  %v4124_v35 = vadd.s32 72, %v3623_v9 }
 0x24a   : > { %v3197_v40 = vpack.c.bf16 %v2078_v33, %v2077_v25  ;;  %v2015_v41 = vmul.f32 %v1740_v39, %v968_v38 }
 0x24b   : > { %3059 = vmatmul.mubr.msk.f32.gmra.mrb[130].mxu1 %vm2154_vm10, %v3481_v49  ;;  %vm2187_vm9 = vcmp.eq.s32.totalorder %v4124_v35, %v4042_v48  ;;  %vm2185_vm10 = vcmp.eq.s32.totalorder %v4118_v27, %v3692_v58 }
 0x24c   : > { %3198 = vmatpush1.bf16.msra.mxu0 %v3197_v40  ;;  %3260 = vmatpush1.bf16.msra.mxu1 %v3197_v40  ;;  %v2079_v56 = vadd.f32 %v2015_v41, %v1951_v37  ;;  %v972_v42 = vpop.f32.mrb[70].mxu0  ;;  %v1744_v44 = vpop.f32.mrb[70].mxu1 }
 0x24d   : > { %v1952_v45 = vmul.f32 %v1744_v44, %v972_v42  ;;  %v974_v46 = vpop.f32.mrb[71].mxu0  ;;  %v1746_v50 = vpop.f32.mrb[71].mxu1  ;;  %3199 = vmatprep.subr.bf16.mxu0 %v3480_v47  ;;  %3245 = vmatprep.subr.bf16.mxu1 %v3480_v47 }
 0x24e   : > { %v2016_v51 = vmul.f32 %v1746_v50, %v974_v46  ;;  %3060 = vmatprep.mubr.msk.f32.mxu1 %vm2159_vm11, %v3481_v49  ;;  %vm2184_vm11 = vcmp.eq.s32.totalorder %v4118_v27, %v3689_v57  ;;  %v4142_v46 = vadd.s32 80, %v3623_v9 }
 0x24f   : > { %3061 = vmatmul.mubr.msk.f32.gmra.mrb[132].mxu1 %vm2158_vm12, %v3481_v49  ;;  %vm2186_vm12 = vcmp.eq.s32.totalorder %v4124_v35, %v3648_v29 }
 0x250   : > { %v2080_v52 = vadd.f32 %v2016_v51, %v1952_v45  ;;  %v978_v53 = vpop.f32.mrb[72].mxu0  ;;  %v1750_v54 = vpop.f32.mrb[72].mxu1  ;;  %3062 = vmatprep.mubr.msk.f32.mxu1 %vm2163_vm13, %v3481_v49  ;;  %vm2189_vm13 = vcmp.eq.s32.totalorder %v4124_v35, %v3692_v58 }
 0x251   : > { %v1953_v59 = vmul.f32 %v1750_v54, %v978_v53  ;;  %v980_v61 = vpop.f32.mrb[73].mxu0  ;;  %v1752_v63 = vpop.f32.mrb[73].mxu1 }
 0x252   : > { %v3200_v18 = vpack.c.bf16 %v2080_v52, %v2079_v56  ;;  %v2017_v0 = vmul.f32 %v1752_v63, %v980_v61  ;;  %v4150_v61 = vadd.s32 88, %v3623_v9 }
 0x253   : > { %3063 = vmatmul.mubr.msk.f32.gmra.mrb[134].mxu1 %vm2162_vm14, %v3481_v49  ;;  %vm2188_vm14 = vcmp.eq.s32.totalorder %v4124_v35, %v3689_v57 }
 0x254   : > { %3201 = vmatpush1.bf16.msra.mxu0 %v3200_v18  ;;  %3261 = vmatpush1.bf16.msra.mxu1 %v3200_v18  ;;  %v2081_v2 = vadd.f32 %v2017_v0, %v1953_v59  ;;  %v984_v3 = vpop.f32.mrb[74].mxu0  ;;  %v1756_v4 = vpop.f32.mrb[74].mxu1 }
 0x255   : > { %v1954_v5 = vmul.f32 %v1756_v4, %v984_v3  ;;  %v986_v6 = vpop.f32.mrb[75].mxu0  ;;  %v1758_v7 = vpop.f32.mrb[75].mxu1  ;;  %3202 = vmatprep.subr.bf16.mxu0 %v3480_v47  ;;  %3246 = vmatprep.subr.bf16.mxu1 %v3480_v47 }
 0x256   : > { %v2018_v10 = vmul.f32 %v1758_v7, %v986_v6  ;;  %3064 = vmatprep.mubr.msk.f32.mxu1 %vm2167_vm15, %v3481_v49  ;;  %vm2191_vm15 = vcmp.eq.s32.totalorder %v4142_v46, %v4042_v48 }
 0x257   : > { %3065 = vmatmul.mubr.msk.f32.gmra.mrb[136].mxu1 %vm2166_vm0, %v3481_v49  ;;  %vm2190_vm0 = vcmp.eq.s32.totalorder %v4142_v46, %v3648_v29 }
 0x258   : > { %v2082_v11 = vadd.f32 %v2018_v10, %v1954_v5  ;;  %v990_v8 = vpop.f32.mrb[76].mxu0  ;;  %v1762_v1 = vpop.f32.mrb[76].mxu1  ;;  %3066 = vmatprep.mubr.msk.f32.mxu1 %vm2171_vm1, %v3481_v49  ;;  %vm2195_vm1 = vcmp.eq.s32.totalorder %v4150_v61, %v4042_v48  ;;  %v4170_v10 = vadd.s32 96, %v3623_v9 }
 0x259   : > { %v1955_v17 = vmul.f32 %v1762_v1, %v990_v8  ;;  %v992_v12 = vpop.f32.mrb[77].mxu0  ;;  %v1764_v13 = vpop.f32.mrb[77].mxu1 }
 0x25a   : > { %v3203_v14 = vpack.c.bf16 %v2082_v11, %v2081_v2  ;;  %v2019_v15 = vmul.f32 %v1764_v13, %v992_v12 }
 0x25b   : > { %3067 = vmatmul.mubr.msk.f32.gmra.mrb[138].mxu1 %vm2170_vm2, %v3481_v49  ;;  %vm2193_vm2 = vcmp.eq.s32.totalorder %v4142_v46, %v3692_v58 }
 0x25c   : > { %3204 = vmatpush1.bf16.msra.mxu0 %v3203_v14  ;;  %3262 = vmatpush1.bf16.msra.mxu1 %v3203_v14  ;;  %v2083_v19 = vadd.f32 %v2019_v15, %v1955_v17  ;;  %v996_v20 = vpop.f32.mrb[78].mxu0  ;;  %v1768_v21 = vpop.f32.mrb[78].mxu1  ;;  %v4178_v14 = vadd.s32 104, %v3623_v9 }
 0x25d   : > { %v1956_v22 = vmul.f32 %v1768_v21, %v996_v20  ;;  %v998_v23 = vpop.f32.mrb[79].mxu0  ;;  %v1770_v25 = vpop.f32.mrb[79].mxu1  ;;  %3205 = vmatprep.subr.bf16.mxu0 %v3480_v47  ;;  %3247 = vmatprep.subr.bf16.mxu1 %v3480_v47 }
 0x25e   : > { %v2020_v26 = vmul.f32 %v1770_v25, %v998_v23  ;;  %3068 = vmatprep.mubr.msk.f32.mxu1 %vm2175_vm3, %v3481_v49  ;;  %vm2192_vm3 = vcmp.eq.s32.totalorder %v4142_v46, %v3689_v57 }
 0x25f   : > { %3069 = vmatmul.mubr.msk.f32.gmra.mrb[140].mxu1 %vm2174_vm4, %v3481_v49  ;;  %vm2194_vm4 = vcmp.eq.s32.totalorder %v4150_v61, %v3648_v29 }
 0x260   : > { %v2084_v16 = vadd.f32 %v2020_v26, %v1956_v22  ;;  %v1002_v28 = vpop.f32.mrb[80].mxu0  ;;  %v1774_v30 = vpop.f32.mrb[80].mxu1  ;;  %3070 = vmatprep.mubr.msk.f32.mxu1 %vm2179_vm5, %v3481_v49  ;;  %vm2197_vm5 = vcmp.eq.s32.totalorder %v4150_v61, %v3692_v58 }
 0x261   : > { %v1957_v31 = vmul.f32 %v1774_v30, %v1002_v28  ;;  %v1004_v33 = vpop.f32.mrb[81].mxu0  ;;  %v1776_v34 = vpop.f32.mrb[81].mxu1  ;;  %v4198_v28 = vadd.s32 112, %v3623_v9 }
 0x262   : > { %v3206_v37 = vpack.c.bf16 %v2084_v16, %v2083_v19  ;;  %v2021_v38 = vmul.f32 %v1776_v34, %v1004_v33 }
 0x263   : > { %3071 = vmatmul.mubr.msk.f32.gmra.mrb[142].mxu1 %vm2178_vm8, %v3481_v49  ;;  %vm2196_vm8 = vcmp.eq.s32.totalorder %v4150_v61, %v3689_v57 }
 0x264   : > { %3207 = vmatpush1.bf16.msra.mxu0 %v3206_v37  ;;  %3263 = vmatpush1.bf16.msra.mxu1 %v3206_v37  ;;  %v2085_v39 = vadd.f32 %v2021_v38, %v1957_v31  ;;  %v1008_v40 = vpop.f32.mrb[82].mxu0  ;;  %v1780_v41 = vpop.f32.mrb[82].mxu1 }
 0x265   : > { %v1958_v56 = vmul.f32 %v1780_v41, %v1008_v40  ;;  %v1010_v42 = vpop.f32.mrb[83].mxu0  ;;  %v1782_v44 = vpop.f32.mrb[83].mxu1  ;;  %3208 = vmatprep.subr.bf16.mxu0 %v3480_v47  ;;  %3248 = vmatprep.subr.bf16.mxu1 %v3480_v47 }
 0x266   : > { %v2022_v45 = vmul.f32 %v1782_v44, %v1010_v42  ;;  %3072 = vmatprep.mubr.msk.f32.mxu1 %vm2183_vm6, %v3481_v49  ;;  %vm2199_vm6 = vcmp.eq.s32.totalorder %v4170_v10, %v4042_v48 }
 0x267   : > { %3073 = vmatmul.mubr.msk.f32.gmra.mrb[144].mxu1 %vm2182_vm7, %v3481_v49  ;;  %vm2198_vm7 = vcmp.eq.s32.totalorder %v4170_v10, %v3648_v29 }
 0x268   : > { %v2086_v50 = vadd.f32 %v2022_v45, %v1958_v56  ;;  %v1014_v51 = vpop.f32.mrb[84].mxu0  ;;  %v1786_v52 = vpop.f32.mrb[84].mxu1  ;;  %3074 = vmatprep.mubr.msk.f32.mxu1 %vm2187_vm9, %v3481_v49  ;;  %vm2203_vm9 = vcmp.eq.s32.totalorder %v4178_v14, %v4042_v48 }
 0x269   : > { %v1959_v53 = vmul.f32 %v1786_v52, %v1014_v51  ;;  %v1016_v54 = vpop.f32.mrb[85].mxu0  ;;  %v1788_v59 = vpop.f32.mrb[85].mxu1 }
 0x26a   : > { %v3209_v63 = vpack.c.bf16 %v2086_v50, %v2085_v39  ;;  %v2023_v18 = vmul.f32 %v1788_v59, %v1016_v54  ;;  %v4206_v39 = vadd.s32 120, %v3623_v9 }
 0x26b   : > { %3075 = vmatmul.mubr.msk.f32.gmra.mrb[146].mxu1 %vm2186_vm12, %v3481_v49  ;;  %vm2201_vm12 = vcmp.eq.s32.totalorder %v4170_v10, %v3692_v58 }
 0x26c   : > { %3210 = vmatpush1.bf16.msra.mxu0 %v3209_v63  ;;  %3264 = vmatpush1.bf16.msra.mxu1 %v3209_v63  ;;  %v2087_v0 = vadd.f32 %v2023_v18, %v1959_v53  ;;  %v1020_v2 = vpop.f32.mrb[86].mxu0  ;;  %v1792_v3 = vpop.f32.mrb[86].mxu1  ;;  %v4225_v53 = vadd.s32 128, %v3623_v9 }
 0x26d   : > { %v1960_v4 = vmul.f32 %v1792_v3, %v1020_v2  ;;  %v1022_v5 = vpop.f32.mrb[87].mxu0  ;;  %v1794_v6 = vpop.f32.mrb[87].mxu1  ;;  %3211 = vmatprep.subr.bf16.mxu0 %v3480_v47  ;;  %3249 = vmatprep.subr.bf16.mxu1 %v3480_v47 }
 0x26e   : > { %v2024_v7 = vmul.f32 %v1794_v6, %v1022_v5  ;;  %3076 = vmatprep.mubr.msk.f32.mxu1 %vm2191_vm15, %v3481_v49  ;;  %vm2200_vm15 = vcmp.eq.s32.totalorder %v4170_v10, %v3689_v57 }
 0x26f   : > { %3077 = vmatmul.mubr.msk.f32.gmra.mrb[148].mxu1 %vm2190_vm0, %v3481_v49  ;;  %vm2202_vm0 = vcmp.eq.s32.totalorder %v4178_v14, %v3648_v29 }
 0x270   : > { %v2088_v11 = vadd.f32 %v2024_v7, %v1960_v4  ;;  %v1026_v8 = vpop.f32.mrb[88].mxu0  ;;  %v1798_v1 = vpop.f32.mrb[88].mxu1  ;;  %3078 = vmatprep.mubr.msk.f32.mxu1 %vm2195_vm1, %v3481_v49  ;;  %vm2210_vm1 = vcmp.eq.s32.totalorder %v4206_v39, %v3648_v29 }
 0x271   : > { %v1961_v17 = vmul.f32 %v1798_v1, %v1026_v8  ;;  %v1028_v12 = vpop.f32.mrb[89].mxu0  ;;  %v1800_v13 = vpop.f32.mrb[89].mxu1 }
 0x272   : > { %v3212_v15 = vpack.c.bf16 %v2088_v11, %v2087_v0  ;;  %v2025_v19 = vmul.f32 %v1800_v13, %v1028_v12 }
 0x273   : > { %3079 = vmatmul.mubr.msk.f32.gmra.mrb[150].mxu1 %vm2194_vm4, %v3481_v49  ;;  %vm2214_vm4 = vcmp.eq.s32.totalorder %v4225_v53, %v3648_v29 }
 0x274   : > { %3213 = vmatpush1.bf16.msra.mxu0 %v3212_v15  ;;  %3265 = vmatpush1.bf16.msra.mxu1 %v3212_v15  ;;  %v2089_v20 = vadd.f32 %v2025_v19, %v1961_v17  ;;  %v1032_v21 = vpop.f32.mrb[90].mxu0  ;;  %v1804_v22 = vpop.f32.mrb[90].mxu1 }
 0x275   : > { %v1962_v23 = vmul.f32 %v1804_v22, %v1032_v21  ;;  %v1034_v25 = vpop.f32.mrb[91].mxu0  ;;  %v1806_v26 = vpop.f32.mrb[91].mxu1  ;;  %3214 = vmatprep.subr.bf16.mxu0 %v3480_v47  ;;  %3250 = vmatprep.subr.bf16.mxu1 %v3480_v47 }
 0x276   : > { %v2026_v16 = vmul.f32 %v1806_v26, %v1034_v25  ;;  %3080 = vmatprep.mubr.msk.f32.mxu1 %vm2199_vm6, %v3481_v49  ;;  %vm2207_vm6 = vcmp.eq.s32.totalorder %v4198_v28, %v4042_v48 }
 0x277   : > { %3081 = vmatmul.mubr.msk.f32.gmra.mrb[152].mxu1 %vm2198_vm7, %v3481_v49  ;;  %vm2206_vm7 = vcmp.eq.s32.totalorder %v4198_v28, %v3648_v29 }
 0x278   : > { %v2090_v30 = vadd.f32 %v2026_v16, %v1962_v23  ;;  %v1038_v31 = vpop.f32.mrb[92].mxu0  ;;  %v1810_v33 = vpop.f32.mrb[92].mxu1  ;;  %3082 = vmatprep.mubr.msk.f32.mxu1 %vm2203_vm9, %v3481_v49  ;;  %vm2211_vm9 = vcmp.eq.s32.totalorder %v4206_v39, %v4042_v48 }
 0x279   : > { %v1963_v34 = vmul.f32 %v1810_v33, %v1038_v31  ;;  %v1040_v37 = vpop.f32.mrb[93].mxu0  ;;  %v1812_v38 = vpop.f32.mrb[93].mxu1 }
 0x27a   : > { %v3215_v40 = vpack.c.bf16 %v2090_v30, %v2089_v20  ;;  %v2027_v41 = vmul.f32 %v1812_v38, %v1040_v37 }
 0x27b   : > { %3083 = vmatmul.mubr.msk.f32.gmra.mrb[154].mxu1 %vm2202_vm0, %v3481_v49  ;;  %vm2216_vm0 = vcmp.eq.s32.totalorder %v4225_v53, %v3689_v57 }
 0x27c   : > { %3216 = vmatpush1.bf16.msra.mxu0 %v3215_v40  ;;  %3266 = vmatpush1.bf16.msra.mxu1 %v3215_v40  ;;  %v2091_v56 = vadd.f32 %v2027_v41, %v1963_v34  ;;  %v1044_v42 = vpop.f32.mrb[94].mxu0  ;;  %v1816_v44 = vpop.f32.mrb[94].mxu1 }
 0x27d   : > { %v1964_v45 = vmul.f32 %v1816_v44, %v1044_v42  ;;  %v1046_v50 = vpop.f32.mrb[95].mxu0  ;;  %v1818_v51 = vpop.f32.mrb[95].mxu1  ;;  %3217 = vmatprep.subr.bf16.mxu0 %v3480_v47  ;;  %3251 = vmatprep.subr.bf16.mxu1 %v3480_v47 }
 0x27e   : > { %v2028_v52 = vmul.f32 %v1818_v51, %v1046_v50  ;;  %3084 = vmatprep.mubr.msk.f32.mxu1 %vm2207_vm6, %v3481_v49  ;;  %vm2165_vm6 = vcmp.eq.s32.totalorder %v3662_v36, %v3692_v58 }
 0x27f   : > { %3085 = vmatmul.mubr.msk.f32.gmra.mrb[156].mxu1 %vm2206_vm7, %v3481_v49  ;;  %vm2161_vm7 = vcmp.eq.s32.totalorder %v3655_v32, %v3692_v58 }
 0x280   : > { %v2092_v54 = vadd.f32 %v2028_v52, %v1964_v45  ;;  %v1050_v59 = vpop.f32.mrb[96].mxu0  ;;  %v1822_v63 = vpop.f32.mrb[96].mxu1  ;;  %3086 = vmatprep.mubr.msk.f32.mxu1 %vm2211_vm9, %v3481_v49  ;;  %vm2215_vm9 = vcmp.eq.s32.totalorder %v4225_v53, %v4042_v48 }
 0x281   : > { %v1965_v18 = vmul.f32 %v1822_v63, %v1050_v59  ;;  %v1052_v0 = vpop.f32.mrb[97].mxu0  ;;  %v1824_v2 = vpop.f32.mrb[97].mxu1 }
 0x282   : > { %v3218_v3 = vpack.c.bf16 %v2092_v54, %v2091_v56  ;;  %v2029_v4 = vmul.f32 %v1824_v2, %v1052_v0 }
 0x283   : > { %3087 = vmatmul.mubr.msk.f32.gmra.mrb[158].mxu1 %vm2210_vm1, %v3481_v49  ;;  %vm2217_vm1 = vcmp.eq.s32.totalorder %v4225_v53, %v3692_v58 }
 0x284   : > { %3219 = vmatpush1.bf16.msra.mxu0 %v3218_v3  ;;  %3267 = vmatpush1.bf16.msra.mxu1 %v3218_v3  ;;  %v2093_v5 = vadd.f32 %v2029_v4, %v1965_v18  ;;  %v1056_v6 = vpop.f32.mrb[98].mxu0  ;;  %v1828_v7 = vpop.f32.mrb[98].mxu1 }
 0x285   : > { %v1966_v11 = vmul.f32 %v1828_v7, %v1056_v6  ;;  %v1058_v8 = vpop.f32.mrb[99].mxu0  ;;  %v1830_v1 = vpop.f32.mrb[99].mxu1  ;;  %3220 = vmatprep.subr.bf16.mxu0 %v3480_v47  ;;  %3252 = vmatprep.subr.bf16.mxu1 %v3480_v47 }
 0x286   : > { %v2030_v17 = vmul.f32 %v1830_v1, %v1058_v8  ;;  %3088 = vmatprep.mubr.msk.f32.mxu1 %vm2215_vm9, %v3481_v49  ;;  %vm2157_vm9 = vcmp.eq.s32.totalorder %v3644_v24, %v3692_v58 }
 0x287   : > { %3089 = vmatmul.mubr.msk.f32.gmra.mrb[160].mxu1 %vm2214_vm4, %v3481_v49  ;;  %vm2152_vm4 = vcmp.eq.s32.totalorder %v3623_v9, %v3689_v57 }
 0x288   : > { %v2094_v48 = vadd.f32 %v2030_v17, %v1966_v11  ;;  %v1062_v12 = vpop.f32.mrb[100].mxu0  ;;  %v1834_v13 = vpop.f32.mrb[100].mxu1  ;;  %3122 = vmatprep.mubr.msk.f32.mxu1 %vm2217_vm1, %v3481_v49  ;;  %vm2156_vm1 = vcmp.eq.s32.totalorder %v3644_v24, %v3689_v57 }
 0x289   : > { %v1967_v29 = vmul.f32 %v1834_v13, %v1062_v12  ;;  %v1064_v15 = vpop.f32.mrb[101].mxu0  ;;  %v1836_v19 = vpop.f32.mrb[101].mxu1 }
 0x28a   : > { %v3221_v20 = vpack.c.bf16 %v2094_v48, %v2093_v5  ;;  %v2031_v21 = vmul.f32 %v1836_v19, %v1064_v15 }
 0x28c   : > { %3222 = vmatpush1.bf16.msra.mxu0 %v3221_v20  ;;  %3268 = vmatpush1.bf16.msra.mxu1 %v3221_v20  ;;  %v2095_v22 = vadd.f32 %v2031_v21, %v1967_v29  ;;  %v1068_v23 = vpop.f32.mrb[102].mxu0  ;;  %v1840_v25 = vpop.f32.mrb[102].mxu1 }
 0x28d   : > { %v1968_v26 = vmul.f32 %v1840_v25, %v1068_v23  ;;  %v1070_v16 = vpop.f32.mrb[103].mxu0  ;;  %v1842_v30 = vpop.f32.mrb[103].mxu1  ;;  %3223 = vmatprep.subr.bf16.mxu0 %v3480_v47  ;;  %3253 = vmatprep.subr.bf16.mxu1 %v3480_v47 }
 0x28e   : > { %v2032_v31 = vmul.f32 %v1842_v30, %v1070_v16 }
 0x290   : > { %v2096_v33 = vadd.f32 %v2032_v31, %v1968_v26  ;;  %v1074_v34 = vpop.f32.mrb[104].mxu0  ;;  %v1846_v37 = vpop.f32.mrb[104].mxu1 }
 0x291   : > { %v1969_v38 = vmul.f32 %v1846_v37, %v1074_v34  ;;  %v1076_v40 = vpop.f32.mrb[105].mxu0  ;;  %v1848_v41 = vpop.f32.mrb[105].mxu1 }
 0x292   : > { %v3224_v56 = vpack.c.bf16 %v2096_v33, %v2095_v22  ;;  %v2033_v42 = vmul.f32 %v1848_v41, %v1076_v40 }
 0x294   : > { %3225 = vmatpush1.bf16.msra.mxu0 %v3224_v56  ;;  %3269 = vmatpush1.bf16.msra.mxu1 %v3224_v56  ;;  %v2097_v44 = vadd.f32 %v2033_v42, %v1969_v38 }
 0x295   : > { %3226 = vmatprep.subr.bf16.mxu0 %v3480_v47  ;;  %3254 = vmatprep.subr.bf16.mxu1 %v3480_v47 }
 0x296   : > { %v1080_v45 = vpop.f32.mrb[106].mxu0  ;;  %v1852_v50 = vpop.f32.mrb[106].mxu1 }
 0x297   : > { %v1970_v51 = vmul.f32 %v1852_v50, %v1080_v45  ;;  %v1082_v52 = vpop.f32.mrb[107].mxu0  ;;  %v1854_v54 = vpop.f32.mrb[107].mxu1 }
 0x298   : > { %v2034_v59 = vmul.f32 %v1854_v54, %v1082_v52 }
 0x29a   : > { %v2098_v63 = vadd.f32 %v2034_v59, %v1970_v51  ;;  %v1086_v18 = vpop.f32.mrb[108].mxu0  ;;  %v1858_v0 = vpop.f32.mrb[108].mxu1 }
 0x29b   : > { %v1971_v2 = vmul.f32 %v1858_v0, %v1086_v18  ;;  %v1088_v3 = vpop.f32.mrb[109].mxu0  ;;  %v1860_v4 = vpop.f32.mrb[109].mxu1 }
 0x29c   : > { %v3227_v5 = vpack.c.bf16 %v2098_v63, %v2097_v44  ;;  %v2035_v6 = vmul.f32 %v1860_v4, %v1088_v3 }
 0x29e   : > { %3228 = vmatpush1.bf16.msra.mxu0 %v3227_v5  ;;  %3270 = vmatpush1.bf16.msra.mxu1 %v3227_v5  ;;  %v2099_v7 = vadd.f32 %v2035_v6, %v1971_v2  ;;  %v1092_v11 = vpop.f32.mrb[110].mxu0  ;;  %v1864_v8 = vpop.f32.mrb[110].mxu1 }
 0x29f   : > { %v1972_v1 = vmul.f32 %v1864_v8, %v1092_v11  ;;  %v1094_v17 = vpop.f32.mrb[111].mxu0  ;;  %v1866_v48 = vpop.f32.mrb[111].mxu1  ;;  %3229 = vmatprep.subr.bf16.mxu0 %v3480_v47  ;;  %3255 = vmatprep.subr.bf16.mxu1 %v3480_v47 }
 0x2a0   : > { %v2036_v12 = vmul.f32 %v1866_v48, %v1094_v17 }
 0x2a2   : > { %v2100_v13 = vadd.f32 %v2036_v12, %v1972_v1  ;;  %v1098_v29 = vpop.f32.mrb[112].mxu0  ;;  %v1870_v15 = vpop.f32.mrb[112].mxu1 }
 0x2a3   : > { %v1973_v19 = vmul.f32 %v1870_v15, %v1098_v29  ;;  %v1100_v20 = vpop.f32.mrb[113].mxu0  ;;  %v1872_v21 = vpop.f32.mrb[113].mxu1 }
 0x2a4   : > { %v3230_v22 = vpack.c.bf16 %v2100_v13, %v2099_v7  ;;  %v2037_v23 = vmul.f32 %v1872_v21, %v1100_v20 }
 0x2a6   : > { %3231 = vmatpush1.bf16.msra.mxu0 %v3230_v22  ;;  %3271 = vmatpush1.bf16.msra.mxu1 %v3230_v22  ;;  %v2101_v25 = vadd.f32 %v2037_v23, %v1973_v19  ;;  %v1104_v26 = vpop.f32.mrb[114].mxu0  ;;  %v1876_v16 = vpop.f32.mrb[114].mxu1 }
 0x2a7   : > { %v1974_v30 = vmul.f32 %v1876_v16, %v1104_v26  ;;  %v1106_v31 = vpop.f32.mrb[115].mxu0  ;;  %v1878_v33 = vpop.f32.mrb[115].mxu1  ;;  %3232 = vmatprep.subr.bf16.mxu0 %v3480_v47  ;;  %3256 = vmatprep.subr.bf16.mxu1 %v3480_v47 }
 0x2a8   : > { %v2038_v34 = vmul.f32 %v1878_v33, %v1106_v31 }
 0x2aa   : > { %v2102_v37 = vadd.f32 %v2038_v34, %v1974_v30  ;;  %v1110_v38 = vpop.f32.mrb[116].mxu0  ;;  %v1882_v40 = vpop.f32.mrb[116].mxu1 }
 0x2ab   : > { %v1975_v41 = vmul.f32 %v1882_v40, %v1110_v38  ;;  %v1112_v56 = vpop.f32.mrb[117].mxu0  ;;  %v1884_v42 = vpop.f32.mrb[117].mxu1 }
 0x2ac   : > { %v3233_v44 = vpack.c.bf16 %v2102_v37, %v2101_v25  ;;  %v2039_v45 = vmul.f32 %v1884_v42, %v1112_v56 }
 0x2ae   : > { %3234 = vmatpush1.bf16.msra.mxu0 %v3233_v44  ;;  %3272 = vmatpush1.bf16.msra.mxu1 %v3233_v44  ;;  %v2103_v50 = vadd.f32 %v2039_v45, %v1975_v41  ;;  %v1116_v51 = vpop.f32.mrb[118].mxu0  ;;  %v1888_v52 = vpop.f32.mrb[118].mxu1 }
 0x2af   : > { %v1976_v54 = vmul.f32 %v1888_v52, %v1116_v51  ;;  %v1118_v59 = vpop.f32.mrb[119].mxu0  ;;  %v1890_v63 = vpop.f32.mrb[119].mxu1  ;;  %3235 = vmatprep.subr.bf16.mxu0 %v3480_v47  ;;  %3257 = vmatprep.subr.bf16.mxu1 %v3480_v47 }
 0x2b0   : > { %v2040_v18 = vmul.f32 %v1890_v63, %v1118_v59 }
 0x2b2   : > { %v2104_v0 = vadd.f32 %v2040_v18, %v1976_v54  ;;  %v1122_v2 = vpop.f32.mrb[120].mxu0  ;;  %v1894_v3 = vpop.f32.mrb[120].mxu1 }
 0x2b3   : > { %v1977_v4 = vmul.f32 %v1894_v3, %v1122_v2  ;;  %v1124_v5 = vpop.f32.mrb[121].mxu0  ;;  %v1896_v6 = vpop.f32.mrb[121].mxu1  ;;  %v2354_v3 = vld [vmem:[#allocation4] sm:$0xff] }
 0x2b4   : > { %v3236_v7 = vpack.c.bf16 %v2104_v0, %v2103_v50  ;;  %v2041_v11 = vmul.f32 %v1896_v6, %v1124_v5  ;;  %v2370_v5 = vld [vmem:[#allocation4 + $0x80] sm:$0xff] }
 0x2b6   : > { %3237 = vmatpush1.bf16.msra.mxu0 %v3236_v7  ;;  %3273 = vmatpush1.bf16.msra.mxu1 %v3236_v7  ;;  %v2105_v8 = vadd.f32 %v2041_v11, %v1977_v4  ;;  %v1128_v1 = vpop.f32.mrb[122].mxu0  ;;  %v1900_v17 = vpop.f32.mrb[122].mxu1 }
 0x2b7   : > { %v1978_v48 = vmul.f32 %v1900_v17, %v1128_v1  ;;  %v1130_v12 = vpop.f32.mrb[123].mxu0  ;;  %v1902_v13 = vpop.f32.mrb[123].mxu1  ;;  %3238 = vmatprep.subr.bf16.mxu0 %v3480_v47  ;;  %3258 = vmatprep.subr.bf16.mxu1 %v3480_v47 }
 0x2b8   : > { %v2042_v29 = vmul.f32 %v1902_v13, %v1130_v12  ;;  %v2355_v12 = vld [vmem:[#allocation4 + $0x8] sm:$0xff] }
 0x2ba   : > { %v2106_v15 = vadd.f32 %v2042_v29, %v1978_v48  ;;  %v1134_v19 = vpop.f32.mrb[124].mxu0  ;;  %v1906_v20 = vpop.f32.mrb[124].mxu1 }
 0x2bb   : > { %v1979_v21 = vmul.f32 %v1906_v20, %v1134_v19  ;;  %v1136_v22 = vpop.f32.mrb[125].mxu0  ;;  %v1908_v23 = vpop.f32.mrb[125].mxu1  ;;  %v2356_v20 = vld [vmem:[#allocation4 + $0x10] sm:$0xff] }
 0x2bc   : > { %v3239_v25 = vpack.c.bf16 %v2106_v15, %v2105_v8  ;;  %v2043_v26 = vmul.f32 %v1908_v23, %v1136_v22 }
 0x2be   : > { %3240 = vmatpush1.bf16.msra.mxu0 %v3239_v25  ;;  %3274 = vmatpush1.bf16.msra.mxu1 %v3239_v25  ;;  %v2107_v16 = vadd.f32 %v2043_v26, %v1979_v21  ;;  %v1140_v30 = vpop.f32.mrb[126].mxu0  ;;  %v1912_v31 = vpop.f32.mrb[126].mxu1  ;;  %v2357_v26 = vld [vmem:[#allocation4 + $0x18] sm:$0xff] }
 0x2bf   : > { %v1980_v33 = vmul.f32 %v1912_v31, %v1140_v30  ;;  %v1142_v34 = vpop.f32.mrb[127].mxu0  ;;  %v1914_v37 = vpop.f32.mrb[127].mxu1  ;;  %3241 = vmatprep.subr.bf16.mxu0 %v3480_v47  ;;  %3259 = vmatprep.subr.bf16.mxu1 %v3480_v47 }
 0x2c0   : > { %v2044_v38 = vmul.f32 %v1914_v37, %v1142_v34  ;;  %v2358_v34 = vld [vmem:[#allocation4 + $0x20] sm:$0xff] }
 0x2c2   : > { %v2108_v40 = vadd.f32 %v2044_v38, %v1980_v33 }
 0x2c4   : > { %v3242_v41 = vpack.c.bf16 %v2108_v40, %v2107_v16 }
 0x2c6   : > { %3243 = vmatpush1.bf16.msra.mxu0 %v3242_v41  ;;  %3275 = vmatpush1.bf16.msra.mxu1 %v3242_v41 }
 0x2c9   : > { %3091 = vmatmul.mubr.msk.f32.vlgmr.msra.gmra.mrb[128].mxu0 %vm2152_vm4, %v3481_v49  ;;  %3123 = vmatmul.mubr.msk.f32.vlgmr.msra.gmra.mrb[162].mxu1 %vm2216_vm0, %v3481_v49  ;;  %vm2160_vm4 = vcmp.eq.s32.totalorder %v3655_v32, %v3689_v57  ;;  %vm2164_vm0 = vcmp.eq.s32.totalorder %v3662_v36, %v3689_v57 }
 0x2ca   : > { %3092 = vmatprep.mubr.msk.f32.mxu0 %vm2157_vm9, %v3481_v49  ;;  %vm2169_vm9 = vcmp.eq.s32.totalorder %v3668_v43, %v3692_v58 }
 0x2cd   : > { %3093 = vmatmul.mubr.msk.f32.gmra.mrb[130].mxu0 %vm2156_vm1, %v3481_v49  ;;  %vm2173_vm1 = vcmp.eq.s32.totalorder %v3683_v55, %v3692_v58 }
 0x2ce   : > { %3094 = vmatprep.mubr.msk.f32.mxu0 %vm2161_vm7, %v3481_v49  ;;  %vm2168_vm7 = vcmp.eq.s32.totalorder %v3668_v43, %v3689_v57 }
 0x2d1   : > { %3095 = vmatmul.mubr.msk.f32.gmra.mrb[132].mxu0 %vm2160_vm4, %v3481_v49  ;;  %vm2177_vm4 = vcmp.eq.s32.totalorder %v3697_v60, %v3692_v58 }
 0x2d2   : > { %3096 = vmatprep.mubr.msk.f32.mxu0 %vm2165_vm6, %v3481_v49  ;;  %vm2172_vm6 = vcmp.eq.s32.totalorder %v3683_v55, %v3689_v57 }
 0x2d5   : > { %3097 = vmatmul.mubr.msk.f32.gmra.mrb[134].mxu0 %vm2164_vm0, %v3481_v49  ;;  %vm2176_vm0 = vcmp.eq.s32.totalorder %v3697_v60, %v3689_v57 }
 0x2d6   : > { %3098 = vmatprep.mubr.msk.f32.mxu0 %vm2169_vm9, %v3481_v49  ;;  %vm2181_vm9 = vcmp.eq.s32.totalorder %v3702_v62, %v3692_v58 }
 0x2d9   : > { %3099 = vmatmul.mubr.msk.f32.gmra.mrb[136].mxu0 %vm2168_vm7, %v3481_v49  ;;  %vm2180_vm7 = vcmp.eq.s32.totalorder %v3702_v62, %v3689_v57 }
 0x2da   : > { %3100 = vmatprep.mubr.msk.f32.mxu0 %vm2173_vm1, %v3481_v49 }
 0x2dd   : > { %3101 = vmatmul.mubr.msk.f32.gmra.mrb[138].mxu0 %vm2172_vm6, %v3481_v49 }
 0x2de   : > { %3102 = vmatprep.mubr.msk.f32.mxu0 %vm2177_vm4, %v3481_v49 }
 0x2e1   : > { %3103 = vmatmul.mubr.msk.f32.gmra.mrb[140].mxu0 %vm2176_vm0, %v3481_v49 }
 0x2e2   : > { %3104 = vmatprep.mubr.msk.f32.mxu0 %vm2181_vm9, %v3481_v49 }
 0x2e5   : > { %3105 = vmatmul.mubr.msk.f32.gmra.mrb[142].mxu0 %vm2180_vm7, %v3481_v49 }
 0x2e6   : > { %3106 = vmatprep.mubr.msk.f32.mxu0 %vm2185_vm10, %v3481_v49  ;;  %vm4451_vm10 = vcmp.eq.s32.totalorder %v4178_v14, %v3692_v58 }
 0x2e9   : > { %3107 = vmatmul.mubr.msk.f32.gmra.mrb[144].mxu0 %vm2184_vm11, %v3481_v49  ;;  %vm4452_vm11 = vcmp.eq.s32.totalorder %v4178_v14, %v3689_v57 }
 0x2ea   : > { %3108 = vmatprep.mubr.msk.f32.mxu0 %vm2189_vm13, %v3481_v49  ;;  %vm4453_vm13 = vcmp.eq.s32.totalorder %v4198_v28, %v3692_v58 }
 0x2ed   : > { %3109 = vmatmul.mubr.msk.f32.gmra.mrb[146].mxu0 %vm2188_vm14, %v3481_v49  ;;  %vm4454_vm14 = vcmp.eq.s32.totalorder %v4198_v28, %v3689_v57 }
 0x2ee   : > { %3110 = vmatprep.mubr.msk.f32.mxu0 %vm2193_vm2, %v3481_v49  ;;  %vm4455_vm2 = vcmp.eq.s32.totalorder %v4206_v39, %v3692_v58 }
 0x2f1   : > { %3111 = vmatmul.mubr.msk.f32.gmra.mrb[148].mxu0 %vm2192_vm3, %v3481_v49  ;;  %vm4456_vm3 = vcmp.eq.s32.totalorder %v4206_v39, %v3689_v57 }
 0x2f2   : > { %3112 = vmatprep.mubr.msk.f32.mxu0 %vm2197_vm5, %v3481_v49 }
 0x2f5   : > { %3113 = vmatmul.mubr.msk.f32.gmra.mrb[150].mxu0 %vm2196_vm8, %v3481_v49 }
 0x2f6   : > { %3114 = vmatprep.mubr.msk.f32.mxu0 %vm2201_vm12, %v3481_v49 }
 0x2f9   : > { %3115 = vmatmul.mubr.msk.f32.gmra.mrb[152].mxu0 %vm2200_vm15, %v3481_v49 }
 0x2fa   : > { %3116 = vmatprep.mubr.msk.f32.mxu0 %vm4451_vm10, %v3481_v49 }
 0x2fd   : > { %3117 = vmatmul.mubr.msk.f32.gmra.mrb[154].mxu0 %vm4452_vm11, %v3481_v49 }
 0x2fe   : > { %3118 = vmatprep.mubr.msk.f32.mxu0 %vm4453_vm13, %v3481_v49 }
 0x301   : > { %3119 = vmatmul.mubr.msk.f32.gmra.mrb[156].mxu0 %vm4454_vm14, %v3481_v49 }
 0x302   : > { %3120 = vmatprep.mubr.msk.f32.mxu0 %vm4455_vm2, %v3481_v49 }
 0x305   : > { %3121 = vmatmul.mubr.msk.f32.gmra.mrb[158].mxu0 %vm4456_vm3, %v3481_v49 }
 0x31a   : > { %v2437_v9 = vpop.f32.mrb[128].mxu1 }
 0x31b   : > { %v2439_v24 = vpop.f32.mrb[129].mxu1 }
 0x31e   : > { %v2442_v32 = vpop.f32.mrb[130].mxu1 }
 0x31f   : > { %v2444_v36 = vpop.f32.mrb[131].mxu1 }
 0x322   : > { %v2447_v43 = vpop.f32.mrb[132].mxu1 }
 0x323   : > { %v2449_v55 = vpop.f32.mrb[133].mxu1 }
 0x324   : > { %v2360_v55 = vld [vmem:[#allocation4 + $0x30] sm:$0xff] }
 0x326   : > { %v2452_v60 = vpop.f32.mrb[134].mxu1 }
 0x327   : > { %v2454_v62 = vpop.f32.mrb[135].mxu1 }
 0x32a   : > { %v2457_v47 = vpop.f32.mrb[136].mxu1 }
 0x32b   : > { %v2459_v27 = vpop.f32.mrb[137].mxu1 }
 0x32e   : > { %v2462_v35 = vpop.f32.mrb[138].mxu1 }
 0x32f   : > { %v2464_v46 = vpop.f32.mrb[139].mxu1 }
 0x332   : > { %v4376_v61 = vpop.f32.mrb[140].mxu1 }
 0x333   : > { %v2469_v58 = vpop.f32.mrb[141].mxu1 }
 0x334   : > { %v2361_v58 = vld [vmem:[#allocation4 + $0x38] sm:$0xff] }
 0x336   : > { %v4378_v10 = vpop.f32.mrb[142].mxu1 }
 0x337   : > { %v2474_v14 = vpop.f32.mrb[143].mxu1 }
 0x33a   : > { %v4380_v57 = vpop.f32.mrb[144].mxu1 }
 0x33b   : > { %v2479_v49 = vpop.f32.mrb[145].mxu1 }
 0x33e   : > { %v4382_v28 = vpop.f32.mrb[146].mxu1 }
 0x33f   : > { %v2484_v39 = vpop.f32.mrb[147].mxu1 }
 0x342   : > { %v4384_v53 = vpop.f32.mrb[148].mxu1 }
 0x343   : > { %v2489_v56 = vpop.f32.mrb[149].mxu1 }
 0x344   : > { %v2362_v56 = vld [vmem:[#allocation4 + $0x40] sm:$0xff] }
 0x346   : > { %v4386_v42 = vpop.f32.mrb[150].mxu1 }
 0x347   : > { %v2494_v44 = vpop.f32.mrb[151].mxu1 }
 0x34a   : > { %v4388_v45 = vpop.f32.mrb[152].mxu1 }
 0x34b   : > { %v2499_v50 = vpop.f32.mrb[153].mxu1 }
 0x34e   : > { %v4390_v51 = vpop.f32.mrb[154].mxu1 }
 0x34f   : > { %v2504_v52 = vpop.f32.mrb[155].mxu1 }
 0x352   : > { %v4392_v54 = vpop.f32.mrb[156].mxu1 }
 0x353   : > { %v2509_v59 = vpop.f32.mrb[157].mxu1 }
 0x354   : > { %v2363_v59 = vld [vmem:[#allocation4 + $0x48] sm:$0xff] }
 0x356   : > { %v4394_v63 = vpop.f32.mrb[158].mxu1 }
 0x357   : > { %v2514_v18 = vpop.f32.mrb[159].mxu1 }
 0x35a   : > { %v2517_v0 = vpop.f32.mrb[160].mxu1 }
 0x35b   : > { %v2519_v2 = vpop.f32.mrb[161].mxu1 }
 0x39c   : > { %v2587_v4 = vpop.f32.mrb[128].mxu0  ;;  %v2667_v6 = vpop.f32.mrb[162].mxu1 }
 0x39d   : > { %v2588_v7 = vadd.f32 %v2587_v4, %v2437_v9  ;;  %v2589_v11 = vpop.f32.mrb[129].mxu0  ;;  %v2668_v8 = vadd.f32 %v2667_v6, %v2517_v0  ;;  %v2669_v1 = vpop.f32.mrb[163].mxu1  ;;  %v2359_v9 = vld [vmem:[#allocation4 + $0x28] sm:$0xff] }
 0x39f   : > { %v2671_v17 = vadd.f32 %v2588_v7, %v2354_v3  ;;  %v2687_v48 = vadd.f32 %v2668_v8, %v2370_v5  ;;  %v2364_v3 = vld [vmem:[#allocation4 + $0x50] sm:$0xff]  ;;  %v2365_v7 = vld [vmem:[#allocation4 + $0x58] sm:$0xff] }
 0x3a0   : > { %v2592_v13 = vpop.f32.mrb[130].mxu0 }
 0x3a1   : > { %2688 = vst [vmem:[#allocation4] sm:$0xff] %v2671_v17  ;;  %v2593_v29 = vadd.f32 %v2592_v13, %v2442_v32  ;;  %v2594_v15 = vpop.f32.mrb[131].mxu0  ;;  %2704 = vst [vmem:[#allocation4 + $0x80] sm:$0xff] %v2687_v48  ;;  %v2366_v17 = vld [vmem:[#allocation4 + $0x60] sm:$0xff] }
 0x3a3   : > { %v2672_v19 = vadd.f32 %v2593_v29, %v2355_v12  ;;  %v2367_v29 = vld [vmem:[#allocation4 + $0x68] sm:$0xff] }
 0x3a4   : > { %v2597_v21 = vpop.f32.mrb[132].mxu0 }
 0x3a5   : > { %2689 = vst [vmem:[#allocation4 + $0x8] sm:$0xff] %v2672_v19  ;;  %v2598_v22 = vadd.f32 %v2597_v21, %v2447_v43  ;;  %v2599_v23 = vpop.f32.mrb[133].mxu0  ;;  %v2368_v21 = vld [vmem:[#allocation4 + $0x70] sm:$0xff] }
 0x3a7   : > { %v2673_v25 = vadd.f32 %v2598_v22, %v2356_v20 }
 0x3a8   : > { %v2602_v16 = vpop.f32.mrb[134].mxu0 }
 0x3a9   : > { %2690 = vst [vmem:[#allocation4 + $0x10] sm:$0xff] %v2673_v25  ;;  %v2603_v30 = vadd.f32 %v2602_v16, %v2452_v60  ;;  %v2604_v31 = vpop.f32.mrb[135].mxu0 }
 0x3ab   : > { %v2674_v33 = vadd.f32 %v2603_v30, %v2357_v26  ;;  %v2369_v26 = vld [vmem:[#allocation4 + $0x78] sm:$0xff] }
 0x3ac   : > { %v2607_v37 = vpop.f32.mrb[136].mxu0 }
 0x3ad   : > { %2691 = vst [vmem:[#allocation4 + $0x18] sm:$0xff] %v2674_v33  ;;  %v2608_v38 = vadd.f32 %v2607_v37, %v2457_v47  ;;  %v2609_v40 = vpop.f32.mrb[137].mxu0  ;;  %v2710_v33 = vld [vmem:[#allocation4 + $0x8] sm:$0xff] (!%p3124_p10) }
 0x3ae   : > { %2727 = vst [vmem:[#allocation9 + $0x8] sm:$0xff] (!%p3124_p10), %v2710_v33 }
 0x3af   : > { %v2675_v41 = vadd.f32 %v2608_v38, %v2358_v34 }
 0x3b0   : > { %v2612_v24 = vpop.f32.mrb[138].mxu0  ;;  %v2711_v34 = vld [vmem:[#allocation4 + $0x10] sm:$0xff] (!%p3124_p10) }
 0x3b1   : > { %2692 = vst [vmem:[#allocation4 + $0x20] sm:$0xff] %v2675_v41  ;;  %v2613_v32 = vadd.f32 %v2612_v24, %v2462_v35  ;;  %v2614_v36 = vpop.f32.mrb[139].mxu0  ;;  %2728 = vst [vmem:[#allocation9 + $0x10] sm:$0xff] (!%p3124_p10), %v2711_v34 }
 0x3b3   : > { %v2676_v43 = vadd.f32 %v2613_v32, %v2359_v9 }
 0x3b4   : > { %v2617_v62 = vpop.f32.mrb[140].mxu0 }
 0x3b5   : > { %2693 = vst [vmem:[#allocation4 + $0x28] sm:$0xff] %v2676_v43  ;;  %v2618_v27 = vadd.f32 %v2617_v62, %v4376_v61  ;;  %v2619_v60 = vpop.f32.mrb[141].mxu0 }
 0x3b7   : > { %v2677_v46 = vadd.f32 %v2618_v27, %v2360_v55  ;;  %v2725_v27 = vld [vmem:[#allocation4 + $0x80] sm:$0xff] (!%p3124_p10) }
 0x3b8   : > { %v2622_v14 = vpop.f32.mrb[142].mxu0  ;;  %v2713_v37 = vld [vmem:[#allocation4 + $0x20] sm:$0xff] (!%p3124_p10)  ;;  %2742 = vst [vmem:[#allocation9 + $0x80] sm:$0xff] (!%p3124_p10), %v2725_v27 }
 0x3b9   : > { %2694 = vst [vmem:[#allocation4 + $0x30] sm:$0xff] %v2677_v46  ;;  %v2623_v47 = vadd.f32 %v2622_v14, %v4378_v10  ;;  %v2624_v49 = vpop.f32.mrb[143].mxu0  ;;  %2730 = vst [vmem:[#allocation9 + $0x20] sm:$0xff] (!%p3124_p10), %v2713_v37 }
 0x3bb   : > { %v2678_v39 = vadd.f32 %v2623_v47, %v2361_v58 }
 0x3bc   : > { %v2627_v44 = vpop.f32.mrb[144].mxu0  ;;  %v2714_v38 = vld [vmem:[#allocation4 + $0x28] sm:$0xff] (!%p3124_p10) }
 0x3bd   : > { %2695 = vst [vmem:[#allocation4 + $0x38] sm:$0xff] %v2678_v39  ;;  %v2628_v35 = vadd.f32 %v2627_v44, %v4380_v57  ;;  %v2629_v50 = vpop.f32.mrb[145].mxu0  ;;  %2731 = vst [vmem:[#allocation9 + $0x28] sm:$0xff] (!%p3124_p10), %v2714_v38 }
 0x3bf   : > { %v2679_v52 = vadd.f32 %v2628_v35, %v2362_v56 }
 0x3c0   : > { %v2632_v18 = vpop.f32.mrb[146].mxu0  ;;  %v2715_v40 = vld [vmem:[#allocation4 + $0x30] sm:$0xff] (!%p3124_p10) }
 0x3c1   : > { %2696 = vst [vmem:[#allocation4 + $0x40] sm:$0xff] %v2679_v52  ;;  %v2633_v61 = vadd.f32 %v2632_v18, %v4382_v28  ;;  %v2634_v0 = vpop.f32.mrb[147].mxu0  ;;  %2732 = vst [vmem:[#allocation9 + $0x30] sm:$0xff] (!%p3124_p10), %v2715_v40 }
 0x3c3   : > { %v2680_v2 = vadd.f32 %v2633_v61, %v2363_v59 }
 0x3c4   : > { %v2637_v4 = vpop.f32.mrb[148].mxu0 }
 0x3c5   : > { %2697 = vst [vmem:[#allocation4 + $0x48] sm:$0xff] %v2680_v2  ;;  %v2638_v10 = vadd.f32 %v2637_v4, %v4384_v53  ;;  %v2639_v5 = vpop.f32.mrb[149].mxu0 }
 0x3c7   : > { %v2681_v6 = vadd.f32 %v2638_v10, %v2364_v3 }
 0x3c8   : > { %v2642_v11 = vpop.f32.mrb[150].mxu0  ;;  %v2717_v41 = vld [vmem:[#allocation4 + $0x40] sm:$0xff] (!%p3124_p10) }
 0x3c9   : > { %2698 = vst [vmem:[#allocation4 + $0x50] sm:$0xff] %v2681_v6  ;;  %v2643_v57 = vadd.f32 %v2642_v11, %v4386_v42  ;;  %v2644_v8 = vpop.f32.mrb[151].mxu0  ;;  %2734 = vst [vmem:[#allocation9 + $0x40] sm:$0xff] (!%p3124_p10), %v2717_v41 }
 0x3cb   : > { %v2682_v1 = vadd.f32 %v2643_v57, %v2365_v7 }
 0x3cc   : > { %v2647_v48 = vpop.f32.mrb[152].mxu0  ;;  %v2718_v9 = vld [vmem:[#allocation4 + $0x48] sm:$0xff] (!%p3124_p10) }
 0x3cd   : > { %2699 = vst [vmem:[#allocation4 + $0x58] sm:$0xff] %v2682_v1  ;;  %v2648_v28 = vadd.f32 %v2647_v48, %v4388_v45  ;;  %v2649_v12 = vpop.f32.mrb[153].mxu0  ;;  %2735 = vst [vmem:[#allocation9 + $0x48] sm:$0xff] (!%p3124_p10), %v2718_v9 }
 0x3cf   : > { %v2683_v13 = vadd.f32 %v2648_v28, %v2366_v17 }
 0x3d0   : > { %v2652_v15 = vpop.f32.mrb[154].mxu0  ;;  %v2719_v24 = vld [vmem:[#allocation4 + $0x50] sm:$0xff] (!%p3124_p10) }
 0x3d1   : > { %2700 = vst [vmem:[#allocation4 + $0x60] sm:$0xff] %v2683_v13  ;;  %v2653_v53 = vadd.f32 %v2652_v15, %v4390_v51  ;;  %v2654_v19 = vpop.f32.mrb[155].mxu0  ;;  %v2709_v51 = vld [vmem:[#allocation4] sm:$0xff] (!%p3124_p10)  ;;  %2736 = vst [vmem:[#allocation9 + $0x50] sm:$0xff] (!%p3124_p10), %v2719_v24 }
 0x3d2   : > { %2726 = vst [vmem:[#allocation9] sm:$0xff] (!%p3124_p10), %v2709_v51 }
 0x3d3   : > { %v2684_v20 = vadd.f32 %v2653_v53, %v2367_v29 }
 0x3d4   : > { %v2657_v22 = vpop.f32.mrb[156].mxu0  ;;  %v2720_v32 = vld [vmem:[#allocation4 + $0x58] sm:$0xff] (!%p3124_p10) }
 0x3d5   : > { %2701 = vst [vmem:[#allocation4 + $0x68] sm:$0xff] %v2684_v20  ;;  %v2658_v42 = vadd.f32 %v2657_v22, %v4392_v54  ;;  %v2659_v23 = vpop.f32.mrb[157].mxu0  ;;  %v2712_v54 = vld [vmem:[#allocation4 + $0x18] sm:$0xff] (!%p3124_p10)  ;;  %2737 = vst [vmem:[#allocation9 + $0x58] sm:$0xff] (!%p3124_p10), %v2720_v32 }
 0x3d6   : > { %2729 = vst [vmem:[#allocation9 + $0x18] sm:$0xff] (!%p3124_p10), %v2712_v54 }
 0x3d7   : > { %v2685_v25 = vadd.f32 %v2658_v42, %v2368_v21  ;;  %2708 = sbr.rel (%p3124_p10) target bundleno = 998 (0x3e6), region = 44 }
 0x3d8   : > { %v2662_v16 = vpop.f32.mrb[158].mxu0  ;;  %v2721_v36 = vld [vmem:[#allocation4 + $0x60] sm:$0xff] (!%p3124_p10) }
 0x3d9   : > { %2702 = vst [vmem:[#allocation4 + $0x70] sm:$0xff] %v2685_v25  ;;  %v2663_v45 = vadd.f32 %v2662_v16, %v4394_v63  ;;  %v2664_v30 = vpop.f32.mrb[159].mxu0  ;;  %v2716_v63 = vld [vmem:[#allocation4 + $0x38] sm:$0xff] (!%p3124_p10)  ;;  %2738 = vst [vmem:[#allocation9 + $0x60] sm:$0xff] (!%p3124_p10), %v2721_v36 }
 0x3da   : > { %2733 = vst [vmem:[#allocation9 + $0x38] sm:$0xff] (!%p3124_p10), %v2716_v63 }
 0x3db   : > { %v2686_v31 = vadd.f32 %v2663_v45, %v2369_v26 }
 0x3dc   : > { %v2722_v43 = vld [vmem:[#allocation4 + $0x68] sm:$0xff] (!%p3124_p10) }
 0x3dd   : > { %2703 = vst [vmem:[#allocation4 + $0x78] sm:$0xff] %v2686_v31  ;;  %2739 = vst [vmem:[#allocation9 + $0x68] sm:$0xff] (!%p3124_p10), %v2722_v43 }
 0x3e0   : > { %v2723_v55 = vld [vmem:[#allocation4 + $0x70] sm:$0xff] }
 0x3e1   : > { %2740 = vst [vmem:[#allocation9 + $0x70] sm:$0xff] %v2723_v55 }
 0x3e4   : > { %v2724_v62 = vld [vmem:[#allocation4 + $0x78] sm:$0xff] }
 0x3e5   : > { %2741 = vst [vmem:[#allocation9 + $0x78] sm:$0xff] %v2724_v62 }
 0x3e6 PF: > { %p3287_p5 = scmp.eq.s32.totalorder %s3524_s16, 1  ;;  %s3482_s25 = smov [#allocation9]  }
 0x3e7   : > { %s2749_s28 = sshll.u32 %s3482_s25, 4  ;;  %s2750_s28 = int_to_ptr.vmem [resolvable:$true] %s2749_s28 }
 0x3e8   : > { %s3405_s29 = scalar_lea.vmem %s2750_s28, 2176  ;;  %p3412_p1 = scmp.lt.s32.totalorder %s2750_s28, %s2750_s28 }
 0x3e9   : > { %p3406_p6 = scmp.ne.s32.totalorder %s2750_s28, %s3405_s29  ;;  %p3413_p2 = scmp.lt.s32.totalorder %s3405_s29, %s3405_s29 }
 0x3eb   : > { %p3407_p11 = pnand %p3406_p6, %p3287_p5  ;;  %p3414_p3 = por %p3413_p2, %p3412_p1 }
 0x3ed   : > { %p3408_p13 = pneg %p3407_p11 }
 0x3ef   : > { %p3415_p0 = pnand %p3414_p3, %p3408_p13 }
 0x3f1   : > { %3418 = shalt.err (!%p3415_p0)
}
 0x3f2   : > { %s3419_s5 = scalar_lea.hbm %s4446_s3, 2176 }
 0x3f3   : > { %p3420_p4 = scmp.ne.s32.totalorder %s4446_s3, %s3419_s5  ;;  %p3425_p8 = scmp.lt.u32.totalorder %s3419_s5, %s4446_s3 }
 0x3f5   : > { %p3421_p12 = pnand %p3420_p4, %p3287_p5 }
 0x3f7   : > { %p3422_p9 = pneg %p3421_p12 }
 0x3f9   : > { %p3427_p7 = pnand %p3425_p8, %p3422_p9 }
 0x3fb   : > { %3430 = shalt.err (!%p3427_p7)
}
 0x3fc   : > { %s3483_s9 = smov 128   ;;  %s3484_s10 = smov 8  }
 0x3fd   : > { %3279 = dma.vmem_to_hbm [thread:$0]  (%p3287_p5), %s2750_s28, 2176, %s4446_s3, [#allocation8], %s3483_s9, %s3483_s9, %s3484_s10  }
 0x3fe   : > { %3456 = dma.done.wait (%p3287_p5), [#allocation8], 2176  }
 0x3ff   : > { %3458 = vsyncadd (%p3287_p5), [#allocation8], 4294965120 }
 0x400 PF: > { %p14_p10 = scmp.ge.s32.totalorder %s3527_s17, 4   ;;  %s4457_s12 = smov %s3465_s13 }
 0x401   : > { %s4458_s13 = smov %s3469_s14  ;;  %s4459_s14 = smov %s3537_s20 }
 0x402   : > { %s4460_s15 = smov %s3527_s17  ;;  %16 = sbr.rel (!%p14_p10) target bundleno = 4 (0x4), region = 79 }
 0x409   :  { %2765 = vsyncpa [#allocation7], 1 }
 0x40a   :  { %2767 = vsyncpa [#allocation7 + $0x1], 1 }
 0x40b   :  { %2768 = vsyncpa [#allocation8], 1 }
 0x40c   :  { %2770 = vsyncpa [#allocation8 + $0x1], 1 }
 0x40d   :  { %2771 = vsyncmov [#allocation5] }
 0x410   :  { %s2772_s16 = vpop.sfrf %2771 }
 0x411   :  { %p3129_p5 = scmp.ne.s32.totalorder %s2772_s16, 0 }
 0x413   :  { %2776 = shalt.err (%p3129_p5)  }
 0x414   :  { %2778 = vsyncmov [#allocation5 + $0x1] }
 0x417   :  { %s2779_s18 = vpop.sfrf %2778 }
 0x418   :  { %p3130_p6 = scmp.ne.s32.totalorder %s2779_s18, 0 }
 0x41a   :  { %2783 = shalt.err (%p3130_p6)  }

</bundles_post_ra>
